<compile_context>
chip_gen: v6e
topology: v6e:2x2x1
jax: 0.10.0
libtpu: 0.0.40
codegen_flags: <defaults>
</compile_context>

<pallas_src>
import math

import jax
import jax.numpy as jnp
from jax import lax
from jax.experimental import pallas as pl
from jax.experimental.pallas import tpu as pltpu  # noqa: F401  (kept for TPU-specific params if scaled up)

# ----------------------------- tiny BERT config -----------------------------
HIDDEN = 32
NUM_LAYERS = 2
NUM_HEADS = 4
HEAD_DIM = HIDDEN // NUM_HEADS
INTERMEDIATE = 64
VOCAB = 100
MAX_POS = 32
TYPE_VOCAB = 2
LN_EPS = 1e-12

BATCH = 2
SEQ = 8
ROWS = BATCH * SEQ


# ------------------------------ kernel helpers ------------------------------
def _layer_norm(x, gamma, beta):
    mu = jnp.mean(x, axis=-1, keepdims=True)
    var = jnp.mean((x - mu) * (x - mu), axis=-1, keepdims=True)
    return (x - mu) * lax.rsqrt(var + LN_EPS) * gamma + beta


_GELU_C = math.sqrt(2.0 / math.pi)


def _gelu(x):
    # tanh-approx GELU: tanh runs on the otherwise-idle EUP slot instead of an
    # erf polynomial on the busy VPU slot.  (Exact BERT GELU uses erf.)
    return 0.5 * x * (1.0 + jnp.tanh(_GELU_C * (x + 0.044715 * x * x * x)))


def _mm(x16, w16):
    # both operands already bf16 (activation cast hoisted at call site); f32 acc
    return jnp.dot(x16, w16, preferred_element_type=jnp.float32)


def _mm_nt(x16, y16):
    # x @ y.T without materializing the transpose (contract last dims of both)
    return lax.dot_general(x16, y16, (((1,), (1,)), ((), ())),
                           preferred_element_type=jnp.float32)


# ------------------------------ fused Pallas kernel -------------------------
def bert_fused_kernel(emb_ref, kbias_ref, emb_g_ref, emb_b_ref,
                      wqkv_ref, bqkv_ref, wo_ref, bo_ref, ln1g_ref, ln1b_ref,
                      w1_ref, b1_ref, w2_ref, b2_ref, ln2g_ref, ln2b_ref,
                      wp_ref, bp_ref, wl_ref, bl_ref, o_ref):
    H, NH, HD = HIDDEN, NUM_HEADS, HEAD_DIM

    # ---- embedding layernorm on the (B*S, H) slab ----
    h = _layer_norm(emb_ref[...], emb_g_ref[...], emb_b_ref[...])        # (ROWS,H) f32

    # ---- block-diagonal additive attention bias, synthesized in-kernel ----
    # batch-id = floor((idx + 0.5) / SEQ) via f32 mul+floor (robust, no int div)
    inv_s = jnp.float32(1.0 / SEQ)
    row_i = lax.broadcasted_iota(jnp.int32, (ROWS, ROWS), 0).astype(jnp.float32)
    col_i = lax.broadcasted_iota(jnp.int32, (ROWS, ROWS), 1).astype(jnp.float32)
    same_batch = (jnp.floor((row_i + 0.5) * inv_s)
                  == jnp.floor((col_i + 0.5) * inv_s))
    bias = jnp.where(same_batch, kbias_ref[...], jnp.float32(-1e9))      # (ROWS,ROWS)
    bias_stk = jnp.concatenate([bias] * NH, axis=0)                      # (NH*ROWS,ROWS)

    # ---- per-head lane masks (same for every layer; hoisted) ----
    lane = lax.broadcasted_iota(jnp.int32, (1, H), 1)
    head_mask = [((lane >= hh * HD) & (lane < (hh + 1) * HD)).astype(jnp.float32)
                 for hh in range(NH)]

    # ---- static unrolled layer loop; all stacked weights stay VMEM-resident ----
    for l in range(NUM_LAYERS):
        # fused QKV projection: one MXU push instead of three (scale folded in Wq)
        h16 = h.astype(jnp.bfloat16)
        qkv = _mm(h16, wqkv_ref[l]) + bqkv_ref[l]                        # (ROWS,3H) f32
        q = qkv[:, 0 * H:1 * H]
        k16 = qkv[:, 1 * H:2 * H].astype(jnp.bfloat16)
        v = qkv[:, 2 * H:3 * H]

        # Head-selective scores via lane masks (no 8-lane slices/relayouts):
        #   (q * m_h) @ k^T == q_h @ k_h^T  since the mask zeroes the other heads.
        # Heads stacked along sublanes -> one softmax over the whole stack.
        s = jnp.concatenate(
            [_mm_nt((q * head_mask[hh]).astype(jnp.bfloat16), k16)
             for hh in range(NH)], axis=0) + bias_stk                    # (NH*ROWS,ROWS)
        s = s - jnp.max(s, axis=-1, keepdims=True)
        p = jnp.exp(s)
        p16 = (p * pl.reciprocal(jnp.sum(p, axis=-1, keepdims=True), approx=True)
               ).astype(jnp.bfloat16)

        # Context: P_h @ (v * m_h) lands each head's output in its own lanes,
        # so summing the per-head terms IS the head concatenation (no relayout).
        ctx = _mm(p16[0:ROWS, :], (v * head_mask[0]).astype(jnp.bfloat16))
        for hh in range(1, NH):
            ctx = ctx + _mm(p16[hh * ROWS:(hh + 1) * ROWS, :],
                            (v * head_mask[hh]).astype(jnp.bfloat16))    # (ROWS,H) f32

        attn = _mm(ctx.astype(jnp.bfloat16), wo_ref[l]) + bo_ref[l]
        h = _layer_norm(h + attn, ln1g_ref[l], ln1b_ref[l])

        h16 = h.astype(jnp.bfloat16)
        ffn = _gelu(_mm(h16, w1_ref[l]) + b1_ref[l])
        ffn = _mm(ffn.astype(jnp.bfloat16), w2_ref[l]) + b2_ref[l]
        h = _layer_norm(h + ffn, ln2g_ref[l], ln2b_ref[l])

    # Pooler + classifier on ALL rows (>=8 sublanes go through the MXU anyway);
    # CLS rows are selected outside the kernel.  Dropout(0.2) = identity here.
    pooled = jnp.tanh(_mm(h.astype(jnp.bfloat16), wp_ref[...]) + bp_ref[...])
    o_ref[...] = _mm(pooled.astype(jnp.bfloat16), wl_ref[...]) + bl_ref[...]


# --------------------------- parameter initialization ------------------------
def init_params(key):
    def nrm(k, shape, scale=0.02):
        return scale * jax.random.normal(k, shape, dtype=jnp.float32)

    keys = iter(jax.random.split(key, 8 + NUM_LAYERS * 16 + 8))
    p = {
        "word_emb": nrm(next(keys), (VOCAB, HIDDEN)),
        "pos_emb": nrm(next(keys), (MAX_POS, HIDDEN)),
        "type_emb": nrm(next(keys), (TYPE_VOCAB, HIDDEN)),
        "emb_ln_g": jnp.ones((HIDDEN,), jnp.float32),
        "emb_ln_b": jnp.zeros((HIDDEN,), jnp.float32),
        "layers": [],
        "pooler_w": nrm(next(keys), (HIDDEN, HIDDEN)),
        "pooler_b": jnp.zeros((HIDDEN,), jnp.float32),
        "lin_w": nrm(next(keys), (HIDDEN, 1)),
        "lin_b": jnp.zeros((1,), jnp.float32),
    }
    for _ in range(NUM_LAYERS):
        lp = {
            "wq": nrm(next(keys), (HIDDEN, HIDDEN)), "bq": jnp.zeros((1, HIDDEN), jnp.float32),
            "wk": nrm(next(keys), (HIDDEN, HIDDEN)), "bk": jnp.zeros((1, HIDDEN), jnp.float32),
            "wv": nrm(next(keys), (HIDDEN, HIDDEN)), "bv": jnp.zeros((1, HIDDEN), jnp.float32),
            "wo": nrm(next(keys), (HIDDEN, HIDDEN)), "bo": jnp.zeros((1, HIDDEN), jnp.float32),
            "ln1_g": jnp.ones((1, HIDDEN), jnp.float32), "ln1_b": jnp.zeros((1, HIDDEN), jnp.float32),
            "w1": nrm(next(keys), (HIDDEN, INTERMEDIATE)), "b1": jnp.zeros((1, INTERMEDIATE), jnp.float32),
            "w2": nrm(next(keys), (INTERMEDIATE, HIDDEN)), "b2": jnp.zeros((1, HIDDEN), jnp.float32),
            "ln2_g": jnp.ones((1, HIDDEN), jnp.float32), "ln2_b": jnp.zeros((1, HIDDEN), jnp.float32),
        }
        p["layers"].append(lp)
    return p


def prepare_fused_params(p):
    """Stack per-layer weights, fuse QKV, cast matmul weights to bf16, fold attn scale."""
    scale = 1.0 / math.sqrt(HEAD_DIM)
    stk = lambda name: jnp.stack([lp[name] for lp in p["layers"]], axis=0)
    wqkv = jnp.stack(
        [jnp.concatenate([lp["wq"] * scale, lp["wk"], lp["wv"]], axis=-1)
         for lp in p["layers"]], axis=0)                                  # (L, H, 3H)
    bqkv = jnp.stack(
        [jnp.concatenate([lp["bq"] * scale, lp["bk"], lp["bv"]], axis=-1)
         for lp in p["layers"]], axis=0)                                  # (L, 1, 3H)
    return {
        "word_emb": p["word_emb"],
        "pos_emb": p["pos_emb"],
        "type_emb": p["type_emb"],
        "emb_ln_g": p["emb_ln_g"].reshape(1, HIDDEN),
        "emb_ln_b": p["emb_ln_b"].reshape(1, HIDDEN),
        "wqkv": wqkv.astype(jnp.bfloat16),                                # scale folded into Wq
        "bqkv": bqkv,                                                     # f32
        "wo": stk("wo").astype(jnp.bfloat16), "bo": stk("bo"),
        "ln1_g": stk("ln1_g"), "ln1_b": stk("ln1_b"),
        "w1": stk("w1").astype(jnp.bfloat16), "b1": stk("b1"),
        "w2": stk("w2").astype(jnp.bfloat16), "b2": stk("b2"),
        "ln2_g": stk("ln2_g"), "ln2_b": stk("ln2_b"),
        "pooler_w": p["pooler_w"].astype(jnp.bfloat16),
        "pooler_b": p["pooler_b"].reshape(1, HIDDEN),
        "lin_w": p["lin_w"].astype(jnp.bfloat16),
        "lin_b": p["lin_b"].reshape(1, 1),
    }


# ------------------------------- full forward ---------------------------------
def bert_model_forward(fp, input_ids, attention_mask, token_type_ids):
    B, S = input_ids.shape
    H, I, L = HIDDEN, INTERMEDIATE, NUM_LAYERS

    # --- embeddings (gathers are plain-JAX glue) ---
    positions = jnp.arange(S, dtype=jnp.int32)
    emb = (fp["word_emb"][input_ids]
           + fp["pos_emb"][positions][None, :, :]
           + fp["type_emb"][token_type_ids])                  # (B, S, H)
    emb = emb.reshape(B * S, H)

    # Only the (1, B*S) key-bias row is DMA'd (0 attended / -10000 masked, BERT
    # convention); the block-diagonal -1e9 cross-batch term is built in-kernel.
    key_bias = ((1.0 - attention_mask.astype(jnp.float32)) * -10000.0).reshape(1, B * S)

    full = lambda shape: pl.BlockSpec(shape, lambda: (0,) * len(shape))
    logits_all = pl.pallas_call(
        bert_fused_kernel,
        out_shape=jax.ShapeDtypeStruct((B * S, 1), jnp.float32),
        in_specs=[
            full((B * S, H)), full((1, B * S)),                # emb slab, key bias row
            full((1, H)), full((1, H)),                        # emb layernorm
            full((L, H, 3 * H)), full((L, 1, 3 * H)),          # fused Wqkv, bqkv
            full((L, H, H)), full((L, 1, H)),                  # Wo, bo
            full((L, 1, H)), full((L, 1, H)),                  # ln1 gamma, beta
            full((L, H, I)), full((L, 1, I)),                  # W1, b1
            full((L, I, H)), full((L, 1, H)),                  # W2, b2
            full((L, 1, H)), full((L, 1, H)),                  # ln2 gamma, beta
            full((H, H)), full((1, H)),                        # pooler W, b
            full((H, 1)), full((1, 1)),                        # classifier W, b
        ],
        out_specs=pl.BlockSpec((B * S, 1), lambda: (0, 0)),
    )(emb, key_bias,
      fp["emb_ln_g"], fp["emb_ln_b"],
      fp["wqkv"], fp["bqkv"], fp["wo"], fp["bo"], fp["ln1_g"], fp["ln1_b"],
      fp["w1"], fp["b1"], fp["w2"], fp["b2"], fp["ln2_g"], fp["ln2_b"],
      fp["pooler_w"], fp["pooler_b"], fp["lin_w"], fp["lin_b"])

    # Select the CLS row of each sequence (pooler/classifier ran on all rows).
    return logits_all[::S]                                    # (B, 1)


# ----------------------------------- main --------------------------------------
if __name__ == "__main__":
    key = jax.random.PRNGKey(0)
    k_param, k_ids, k_types = jax.random.split(key, 3)

    params = init_params(k_param)
    fused = prepare_fused_params(params)

    input_ids = jax.random.randint(k_ids, (BATCH, SEQ), 0, VOCAB, dtype=jnp.int32)
    attention_mask = jnp.ones((BATCH, SEQ), dtype=jnp.int32).at[1, SEQ - 2:].set(0)
    token_type_ids = jax.random.randint(k_types, (BATCH, SEQ), 0, TYPE_VOCAB, dtype=jnp.int32)

    fwd = jax.jit(bert_model_forward)
    out = fwd(fused, input_ids, attention_mask, token_type_ids)
    out = jax.block_until_ready(out)
    assert out.shape == (BATCH, 1) and out.dtype == jnp.float32
    print("KERNEL_OK")
</pallas_src>

<mosaic_0001>
module attributes {stable_mosaic.version = 11 : i64} {
  func.func @bert_fused_kernel(%arg0: memref<16x32xf32, #tpu.memory_space<vmem>>, %arg1: memref<1x16xf32, #tpu.memory_space<vmem>>, %arg2: memref<1x32xf32, #tpu.memory_space<vmem>>, %arg3: memref<1x32xf32, #tpu.memory_space<vmem>>, %arg4: memref<2x32x96xbf16, #tpu.memory_space<vmem>>, %arg5: memref<2x1x96xf32, #tpu.memory_space<vmem>>, %arg6: memref<2x32x32xbf16, #tpu.memory_space<vmem>>, %arg7: memref<2x1x32xf32, #tpu.memory_space<vmem>>, %arg8: memref<2x1x32xf32, #tpu.memory_space<vmem>>, %arg9: memref<2x1x32xf32, #tpu.memory_space<vmem>>, %arg10: memref<2x32x64xbf16, #tpu.memory_space<vmem>>, %arg11: memref<2x1x64xf32, #tpu.memory_space<vmem>>, %arg12: memref<2x64x32xbf16, #tpu.memory_space<vmem>>, %arg13: memref<2x1x32xf32, #tpu.memory_space<vmem>>, %arg14: memref<2x1x32xf32, #tpu.memory_space<vmem>>, %arg15: memref<2x1x32xf32, #tpu.memory_space<vmem>>, %arg16: memref<32x32xbf16, #tpu.memory_space<vmem>>, %arg17: memref<1x32xf32, #tpu.memory_space<vmem>>, %arg18: memref<32x1xbf16, #tpu.memory_space<vmem>>, %arg19: memref<1x1xf32, #tpu.memory_space<vmem>>, %arg20: memref<16x1xf32, #tpu.memory_space<vmem>>) attributes {dimension_semantics = [], scalar_prefetch = 0 : i64, scratch_operands = 0 : i64, tpu.core_type = #tpu.core_type<tc>} {
    %c0 = arith.constant 0 : index
    %c0_0 = arith.constant 0 : index
    %0 = vector.load %arg0[%c0, %c0_0] : memref<16x32xf32, #tpu.memory_space<vmem>>, vector<16x32xf32>
    %c0_1 = arith.constant 0 : index
    %c0_2 = arith.constant 0 : index
    %1 = vector.load %arg2[%c0_1, %c0_2] : memref<1x32xf32, #tpu.memory_space<vmem>>, vector<1x32xf32>
    %c0_3 = arith.constant 0 : index
    %c0_4 = arith.constant 0 : index
    %2 = vector.load %arg3[%c0_3, %c0_4] : memref<1x32xf32, #tpu.memory_space<vmem>>, vector<1x32xf32>
    %cst = arith.constant dense<0.000000e+00> : vector<16xf32>
    %3 = vector.multi_reduction <add>, %0, %cst [1] : vector<16x32xf32> to vector<16xf32>
    %4 = vector.shape_cast %3 : vector<16xf32> to vector<16x1xf32>
    %cst_5 = arith.constant 3.200000e+01 : f32
    %5 = vector.broadcast %cst_5 : f32 to vector<16x1xf32>
    %6 = arith.divf %4, %5 : vector<16x1xf32>
    %7 = vector.broadcast %6 : vector<16x1xf32> to vector<16x32xf32>
    %8 = arith.subf %0, %7 : vector<16x32xf32>
    %9 = vector.broadcast %6 : vector<16x1xf32> to vector<16x32xf32>
    %10 = arith.subf %0, %9 : vector<16x32xf32>
    %11 = arith.mulf %8, %10 : vector<16x32xf32>
    %cst_6 = arith.constant dense<0.000000e+00> : vector<16xf32>
    %12 = vector.multi_reduction <add>, %11, %cst_6 [1] : vector<16x32xf32> to vector<16xf32>
    %13 = vector.shape_cast %12 : vector<16xf32> to vector<16x1xf32>
    %cst_7 = arith.constant 3.200000e+01 : f32
    %14 = vector.broadcast %cst_7 : f32 to vector<16x1xf32>
    %15 = arith.divf %13, %14 : vector<16x1xf32>
    %16 = vector.broadcast %6 : vector<16x1xf32> to vector<16x32xf32>
    %17 = arith.subf %0, %16 : vector<16x32xf32>
    %cst_8 = arith.constant 9.99999996E-13 : f32
    %18 = vector.broadcast %cst_8 : f32 to vector<16x1xf32>
    %19 = arith.addf %15, %18 : vector<16x1xf32>
    %20 = math.rsqrt %19 : vector<16x1xf32>
    %21 = vector.broadcast %20 : vector<16x1xf32> to vector<16x32xf32>
    %22 = arith.mulf %17, %21 : vector<16x32xf32>
    %23 = vector.broadcast %1 : vector<1x32xf32> to vector<16x32xf32>
    %24 = arith.mulf %22, %23 : vector<16x32xf32>
    %25 = vector.broadcast %2 : vector<1x32xf32> to vector<16x32xf32>
    %26 = arith.addf %24, %25 : vector<16x32xf32>
    %27 = tpu.iota {dimensions = array<i32: 0>} : vector<16x16xi32>
    %28 = arith.sitofp %27 : vector<16x16xi32> to vector<16x16xf32>
    %29 = tpu.iota {dimensions = array<i32: 1>} : vector<16x16xi32>
    %30 = arith.sitofp %29 : vector<16x16xi32> to vector<16x16xf32>
    %cst_9 = arith.constant 5.000000e-01 : f32
    %31 = vector.broadcast %cst_9 : f32 to vector<16x16xf32>
    %32 = arith.addf %28, %31 : vector<16x16xf32>
    %cst_10 = arith.constant 1.250000e-01 : f32
    %33 = vector.broadcast %cst_10 : f32 to vector<16x16xf32>
    %34 = arith.mulf %32, %33 : vector<16x16xf32>
    %35 = math.floor %34 : vector<16x16xf32>
    %cst_11 = arith.constant 5.000000e-01 : f32
    %36 = vector.broadcast %cst_11 : f32 to vector<16x16xf32>
    %37 = arith.addf %30, %36 : vector<16x16xf32>
    %cst_12 = arith.constant 1.250000e-01 : f32
    %38 = vector.broadcast %cst_12 : f32 to vector<16x16xf32>
    %39 = arith.mulf %37, %38 : vector<16x16xf32>
    %40 = math.floor %39 : vector<16x16xf32>
    %41 = arith.cmpf oeq, %35, %40 : vector<16x16xf32>
    %c0_13 = arith.constant 0 : index
    %c0_14 = arith.constant 0 : index
    %42 = vector.load %arg1[%c0_13, %c0_14] : memref<1x16xf32, #tpu.memory_space<vmem>>, vector<1x16xf32>
    %cst_15 = arith.constant -1.000000e+09 : f32
    %43 = vector.shape_cast %42 : vector<1x16xf32> to vector<1x16xf32>
    %44 = vector.broadcast %43 : vector<1x16xf32> to vector<16x16xf32>
    %45 = vector.broadcast %cst_15 : f32 to vector<16x16xf32>
    %46 = arith.select %41, %44, %45 : vector<16x16xi1>, vector<16x16xf32>
    %47 = tpu.concatenate %46, %46, %46, %46 in 0 : vector<16x16xf32>, vector<16x16xf32>, vector<16x16xf32>, vector<16x16xf32> -> vector<64x16xf32>
    %48 = tpu.iota {dimensions = array<i32: 1>} : vector<1x32xi32>
    %c0_i32 = arith.constant 0 : i32
    %49 = vector.broadcast %c0_i32 : i32 to vector<1x32xi32>
    %50 = arith.cmpi sge, %48, %49 : vector<1x32xi32>
    %c8_i32 = arith.constant 8 : i32
    %51 = vector.broadcast %c8_i32 : i32 to vector<1x32xi32>
    %52 = arith.cmpi slt, %48, %51 : vector<1x32xi32>
    %53 = arith.andi %50, %52 : vector<1x32xi1>
    %54 = arith.extui %53 : vector<1x32xi1> to vector<1x32xi32>
    %55 = arith.sitofp %54 : vector<1x32xi32> to vector<1x32xf32>
    %c8_i32_16 = arith.constant 8 : i32
    %56 = vector.broadcast %c8_i32_16 : i32 to vector<1x32xi32>
    %57 = arith.cmpi sge, %48, %56 : vector<1x32xi32>
    %c16_i32 = arith.constant 16 : i32
    %58 = vector.broadcast %c16_i32 : i32 to vector<1x32xi32>
    %59 = arith.cmpi slt, %48, %58 : vector<1x32xi32>
    %60 = arith.andi %57, %59 : vector<1x32xi1>
    %61 = arith.extui %60 : vector<1x32xi1> to vector<1x32xi32>
    %62 = arith.sitofp %61 : vector<1x32xi32> to vector<1x32xf32>
    %c16_i32_17 = arith.constant 16 : i32
    %63 = vector.broadcast %c16_i32_17 : i32 to vector<1x32xi32>
    %64 = arith.cmpi sge, %48, %63 : vector<1x32xi32>
    %c24_i32 = arith.constant 24 : i32
    %65 = vector.broadcast %c24_i32 : i32 to vector<1x32xi32>
    %66 = arith.cmpi slt, %48, %65 : vector<1x32xi32>
    %67 = arith.andi %64, %66 : vector<1x32xi1>
    %68 = arith.extui %67 : vector<1x32xi1> to vector<1x32xi32>
    %69 = arith.sitofp %68 : vector<1x32xi32> to vector<1x32xf32>
    %c24_i32_18 = arith.constant 24 : i32
    %70 = vector.broadcast %c24_i32_18 : i32 to vector<1x32xi32>
    %71 = arith.cmpi sge, %48, %70 : vector<1x32xi32>
    %c32_i32 = arith.constant 32 : i32
    %72 = vector.broadcast %c32_i32 : i32 to vector<1x32xi32>
    %73 = arith.cmpi slt, %48, %72 : vector<1x32xi32>
    %74 = arith.andi %71, %73 : vector<1x32xi1>
    %75 = arith.extui %74 : vector<1x32xi1> to vector<1x32xi32>
    %76 = arith.sitofp %75 : vector<1x32xi32> to vector<1x32xf32>
    %77 = arith.truncf %26 : vector<16x32xf32> to vector<16x32xbf16>
    %c0_19 = arith.constant 0 : index
    %c0_20 = arith.constant 0 : index
    %c0_21 = arith.constant 0 : index
    %78 = vector.load %arg4[%c0_19, %c0_20, %c0_21] : memref<2x32x96xbf16, #tpu.memory_space<vmem>>, vector<1x32x96xbf16>
    %79 = vector.shape_cast %78 : vector<1x32x96xbf16> to vector<32x96xbf16>
    %cst_22 = arith.constant dense<0.000000e+00> : vector<16x96xf32>
    %80 = tpu.matmul %77, %79, %cst_22 {dimension_numbers = #tpu.dot_dimension_numbers<[1], [0], [0], [1], [0, 0, 1, 1], [], []>} : vector<16x32xbf16>, vector<32x96xbf16>, vector<16x96xf32> -> vector<16x96xf32>
    %c0_23 = arith.constant 0 : index
    %c0_24 = arith.constant 0 : index
    %c0_25 = arith.constant 0 : index
    %81 = vector.load %arg5[%c0_23, %c0_24, %c0_25] : memref<2x1x96xf32, #tpu.memory_space<vmem>>, vector<1x1x96xf32>
    %82 = vector.shape_cast %81 : vector<1x1x96xf32> to vector<1x96xf32>
    %83 = vector.broadcast %82 : vector<1x96xf32> to vector<16x96xf32>
    %84 = arith.addf %80, %83 : vector<16x96xf32>
    %85 = vector.extract_strided_slice %84 {offsets = [0, 0], sizes = [16, 32], strides = [1, 1]} : vector<16x96xf32> to vector<16x32xf32>
    %86 = vector.extract_strided_slice %84 {offsets = [0, 32], sizes = [16, 32], strides = [1, 1]} : vector<16x96xf32> to vector<16x32xf32>
    %87 = arith.truncf %86 : vector<16x32xf32> to vector<16x32xbf16>
    %88 = vector.extract_strided_slice %84 {offsets = [0, 64], sizes = [16, 32], strides = [1, 1]} : vector<16x96xf32> to vector<16x32xf32>
    %89 = vector.broadcast %55 : vector<1x32xf32> to vector<16x32xf32>
    %90 = arith.mulf %85, %89 : vector<16x32xf32>
    %91 = arith.truncf %90 : vector<16x32xf32> to vector<16x32xbf16>
    %cst_26 = arith.constant dense<0.000000e+00> : vector<16x16xf32>
    %92 = tpu.matmul %91, %87, %cst_26 {dimension_numbers = #tpu.dot_dimension_numbers<[1], [1], [0], [0], [0, 0, 1, 0], [], []>} : vector<16x32xbf16>, vector<16x32xbf16>, vector<16x16xf32> -> vector<16x16xf32>
    %93 = vector.broadcast %62 : vector<1x32xf32> to vector<16x32xf32>
    %94 = arith.mulf %85, %93 : vector<16x32xf32>
    %95 = arith.truncf %94 : vector<16x32xf32> to vector<16x32xbf16>
    %cst_27 = arith.constant dense<0.000000e+00> : vector<16x16xf32>
    %96 = tpu.matmul %95, %87, %cst_27 {dimension_numbers = #tpu.dot_dimension_numbers<[1], [1], [0], [0], [0, 0, 1, 0], [], []>} : vector<16x32xbf16>, vector<16x32xbf16>, vector<16x16xf32> -> vector<16x16xf32>
    %97 = vector.broadcast %69 : vector<1x32xf32> to vector<16x32xf32>
    %98 = arith.mulf %85, %97 : vector<16x32xf32>
    %99 = arith.truncf %98 : vector<16x32xf32> to vector<16x32xbf16>
    %cst_28 = arith.constant dense<0.000000e+00> : vector<16x16xf32>
    %100 = tpu.matmul %99, %87, %cst_28 {dimension_numbers = #tpu.dot_dimension_numbers<[1], [1], [0], [0], [0, 0, 1, 0], [], []>} : vector<16x32xbf16>, vector<16x32xbf16>, vector<16x16xf32> -> vector<16x16xf32>
    %101 = vector.broadcast %76 : vector<1x32xf32> to vector<16x32xf32>
    %102 = arith.mulf %85, %101 : vector<16x32xf32>
    %103 = arith.truncf %102 : vector<16x32xf32> to vector<16x32xbf16>
    %cst_29 = arith.constant dense<0.000000e+00> : vector<16x16xf32>
    %104 = tpu.matmul %103, %87, %cst_29 {dimension_numbers = #tpu.dot_dimension_numbers<[1], [1], [0], [0], [0, 0, 1, 0], [], []>} : vector<16x32xbf16>, vector<16x32xbf16>, vector<16x16xf32> -> vector<16x16xf32>
    %105 = tpu.concatenate %92, %96, %100, %104 in 0 : vector<16x16xf32>, vector<16x16xf32>, vector<16x16xf32>, vector<16x16xf32> -> vector<64x16xf32>
    %106 = arith.addf %105, %47 : vector<64x16xf32>
    %cst_30 = arith.constant dense<0xFF800000> : vector<64xf32>
    %107 = vector.multi_reduction <maximumf>, %106, %cst_30 [1] : vector<64x16xf32> to vector<64xf32>
    %108 = vector.shape_cast %107 : vector<64xf32> to vector<64x1xf32>
    %109 = vector.broadcast %108 : vector<64x1xf32> to vector<64x16xf32>
    %110 = arith.subf %106, %109 : vector<64x16xf32>
    %111 = math.exp %110 : vector<64x16xf32>
    %cst_31 = arith.constant dense<0.000000e+00> : vector<64xf32>
    %112 = vector.multi_reduction <add>, %111, %cst_31 [1] : vector<64x16xf32> to vector<64xf32>
    %113 = vector.shape_cast %112 : vector<64xf32> to vector<64x1xf32>
    %114 = tpu.reciprocal %113 {approx = true} : vector<64x1xf32> -> vector<64x1xf32>
    %115 = vector.broadcast %114 : vector<64x1xf32> to vector<64x16xf32>
    %116 = arith.mulf %111, %115 : vector<64x16xf32>
    %117 = arith.truncf %116 : vector<64x16xf32> to vector<64x16xbf16>
    %118 = vector.extract_strided_slice %117 {offsets = [0, 0], sizes = [16, 16], strides = [1, 1]} : vector<64x16xbf16> to vector<16x16xbf16>
    %119 = vector.broadcast %55 : vector<1x32xf32> to vector<16x32xf32>
    %120 = arith.mulf %88, %119 : vector<16x32xf32>
    %121 = arith.truncf %120 : vector<16x32xf32> to vector<16x32xbf16>
    %cst_32 = arith.constant dense<0.000000e+00> : vector<16x32xf32>
    %122 = tpu.matmul %118, %121, %cst_32 {dimension_numbers = #tpu.dot_dimension_numbers<[1], [0], [0], [1], [0, 0, 1, 1], [], []>} : vector<16x16xbf16>, vector<16x32xbf16>, vector<16x32xf32> -> vector<16x32xf32>
    %123 = vector.extract_strided_slice %117 {offsets = [16, 0], sizes = [16, 16], strides = [1, 1]} : vector<64x16xbf16> to vector<16x16xbf16>
    %124 = vector.broadcast %62 : vector<1x32xf32> to vector<16x32xf32>
    %125 = arith.mulf %88, %124 : vector<16x32xf32>
    %126 = arith.truncf %125 : vector<16x32xf32> to vector<16x32xbf16>
    %cst_33 = arith.constant dense<0.000000e+00> : vector<16x32xf32>
    %127 = tpu.matmul %123, %126, %cst_33 {dimension_numbers = #tpu.dot_dimension_numbers<[1], [0], [0], [1], [0, 0, 1, 1], [], []>} : vector<16x16xbf16>, vector<16x32xbf16>, vector<16x32xf32> -> vector<16x32xf32>
    %128 = arith.addf %122, %127 : vector<16x32xf32>
    %129 = vector.extract_strided_slice %117 {offsets = [32, 0], sizes = [16, 16], strides = [1, 1]} : vector<64x16xbf16> to vector<16x16xbf16>
    %130 = vector.broadcast %69 : vector<1x32xf32> to vector<16x32xf32>
    %131 = arith.mulf %88, %130 : vector<16x32xf32>
    %132 = arith.truncf %131 : vector<16x32xf32> to vector<16x32xbf16>
    %cst_34 = arith.constant dense<0.000000e+00> : vector<16x32xf32>
    %133 = tpu.matmul %129, %132, %cst_34 {dimension_numbers = #tpu.dot_dimension_numbers<[1], [0], [0], [1], [0, 0, 1, 1], [], []>} : vector<16x16xbf16>, vector<16x32xbf16>, vector<16x32xf32> -> vector<16x32xf32>
    %134 = arith.addf %128, %133 : vector<16x32xf32>
    %135 = vector.extract_strided_slice %117 {offsets = [48, 0], sizes = [16, 16], strides = [1, 1]} : vector<64x16xbf16> to vector<16x16xbf16>
    %136 = vector.broadcast %76 : vector<1x32xf32> to vector<16x32xf32>
    %137 = arith.mulf %88, %136 : vector<16x32xf32>
    %138 = arith.truncf %137 : vector<16x32xf32> to vector<16x32xbf16>
    %cst_35 = arith.constant dense<0.000000e+00> : vector<16x32xf32>
    %139 = tpu.matmul %135, %138, %cst_35 {dimension_numbers = #tpu.dot_dimension_numbers<[1], [0], [0], [1], [0, 0, 1, 1], [], []>} : vector<16x16xbf16>, vector<16x32xbf16>, vector<16x32xf32> -> vector<16x32xf32>
    %140 = arith.addf %134, %139 : vector<16x32xf32>
    %141 = arith.truncf %140 : vector<16x32xf32> to vector<16x32xbf16>
    %c0_36 = arith.constant 0 : index
    %c0_37 = arith.constant 0 : index
    %c0_38 = arith.constant 0 : index
    %142 = vector.load %arg6[%c0_36, %c0_37, %c0_38] : memref<2x32x32xbf16, #tpu.memory_space<vmem>>, vector<1x32x32xbf16>
    %143 = vector.shape_cast %142 : vector<1x32x32xbf16> to vector<32x32xbf16>
    %cst_39 = arith.constant dense<0.000000e+00> : vector<16x32xf32>
    %144 = tpu.matmul %141, %143, %cst_39 {dimension_numbers = #tpu.dot_dimension_numbers<[1], [0], [0], [1], [0, 0, 1, 1], [], []>} : vector<16x32xbf16>, vector<32x32xbf16>, vector<16x32xf32> -> vector<16x32xf32>
    %c0_40 = arith.constant 0 : index
    %c0_41 = arith.constant 0 : index
    %c0_42 = arith.constant 0 : index
    %145 = vector.load %arg7[%c0_40, %c0_41, %c0_42] : memref<2x1x32xf32, #tpu.memory_space<vmem>>, vector<1x1x32xf32>
    %146 = vector.shape_cast %145 : vector<1x1x32xf32> to vector<1x32xf32>
    %147 = vector.broadcast %146 : vector<1x32xf32> to vector<16x32xf32>
    %148 = arith.addf %144, %147 : vector<16x32xf32>
    %149 = arith.addf %26, %148 : vector<16x32xf32>
    %c0_43 = arith.constant 0 : index
    %c0_44 = arith.constant 0 : index
    %c0_45 = arith.constant 0 : index
    %150 = vector.load %arg8[%c0_43, %c0_44, %c0_45] : memref<2x1x32xf32, #tpu.memory_space<vmem>>, vector<1x1x32xf32>
    %151 = vector.shape_cast %150 : vector<1x1x32xf32> to vector<1x32xf32>
    %c0_46 = arith.constant 0 : index
    %c0_47 = arith.constant 0 : index
    %c0_48 = arith.constant 0 : index
    %152 = vector.load %arg9[%c0_46, %c0_47, %c0_48] : memref<2x1x32xf32, #tpu.memory_space<vmem>>, vector<1x1x32xf32>
    %153 = vector.shape_cast %152 : vector<1x1x32xf32> to vector<1x32xf32>
    %cst_49 = arith.constant dense<0.000000e+00> : vector<16xf32>
    %154 = vector.multi_reduction <add>, %149, %cst_49 [1] : vector<16x32xf32> to vector<16xf32>
    %155 = vector.shape_cast %154 : vector<16xf32> to vector<16x1xf32>
    %cst_50 = arith.constant 3.200000e+01 : f32
    %156 = vector.broadcast %cst_50 : f32 to vector<16x1xf32>
    %157 = arith.divf %155, %156 : vector<16x1xf32>
    %158 = vector.broadcast %157 : vector<16x1xf32> to vector<16x32xf32>
    %159 = arith.subf %149, %158 : vector<16x32xf32>
    %160 = vector.broadcast %157 : vector<16x1xf32> to vector<16x32xf32>
    %161 = arith.subf %149, %160 : vector<16x32xf32>
    %162 = arith.mulf %159, %161 : vector<16x32xf32>
    %cst_51 = arith.constant dense<0.000000e+00> : vector<16xf32>
    %163 = vector.multi_reduction <add>, %162, %cst_51 [1] : vector<16x32xf32> to vector<16xf32>
    %164 = vector.shape_cast %163 : vector<16xf32> to vector<16x1xf32>
    %cst_52 = arith.constant 3.200000e+01 : f32
    %165 = vector.broadcast %cst_52 : f32 to vector<16x1xf32>
    %166 = arith.divf %164, %165 : vector<16x1xf32>
    %167 = vector.broadcast %157 : vector<16x1xf32> to vector<16x32xf32>
    %168 = arith.subf %149, %167 : vector<16x32xf32>
    %cst_53 = arith.constant 9.99999996E-13 : f32
    %169 = vector.broadcast %cst_53 : f32 to vector<16x1xf32>
    %170 = arith.addf %166, %169 : vector<16x1xf32>
    %171 = math.rsqrt %170 : vector<16x1xf32>
    %172 = vector.broadcast %171 : vector<16x1xf32> to vector<16x32xf32>
    %173 = arith.mulf %168, %172 : vector<16x32xf32>
    %174 = vector.broadcast %151 : vector<1x32xf32> to vector<16x32xf32>
    %175 = arith.mulf %173, %174 : vector<16x32xf32>
    %176 = vector.broadcast %153 : vector<1x32xf32> to vector<16x32xf32>
    %177 = arith.addf %175, %176 : vector<16x32xf32>
    %178 = arith.truncf %177 : vector<16x32xf32> to vector<16x32xbf16>
    %c0_54 = arith.constant 0 : index
    %c0_55 = arith.constant 0 : index
    %c0_56 = arith.constant 0 : index
    %179 = vector.load %arg10[%c0_54, %c0_55, %c0_56] : memref<2x32x64xbf16, #tpu.memory_space<vmem>>, vector<1x32x64xbf16>
    %180 = vector.shape_cast %179 : vector<1x32x64xbf16> to vector<32x64xbf16>
    %cst_57 = arith.constant dense<0.000000e+00> : vector<16x64xf32>
    %181 = tpu.matmul %178, %180, %cst_57 {dimension_numbers = #tpu.dot_dimension_numbers<[1], [0], [0], [1], [0, 0, 1, 1], [], []>} : vector<16x32xbf16>, vector<32x64xbf16>, vector<16x64xf32> -> vector<16x64xf32>
    %c0_58 = arith.constant 0 : index
    %c0_59 = arith.constant 0 : index
    %c0_60 = arith.constant 0 : index
    %182 = vector.load %arg11[%c0_58, %c0_59, %c0_60] : memref<2x1x64xf32, #tpu.memory_space<vmem>>, vector<1x1x64xf32>
    %183 = vector.shape_cast %182 : vector<1x1x64xf32> to vector<1x64xf32>
    %184 = vector.broadcast %183 : vector<1x64xf32> to vector<16x64xf32>
    %185 = arith.addf %181, %184 : vector<16x64xf32>
    %cst_61 = arith.constant 5.000000e-01 : f32
    %186 = vector.broadcast %cst_61 : f32 to vector<16x64xf32>
    %187 = arith.mulf %186, %185 : vector<16x64xf32>
    %cst_62 = arith.constant 4.471500e-02 : f32
    %188 = vector.broadcast %cst_62 : f32 to vector<16x64xf32>
    %189 = arith.mulf %188, %185 : vector<16x64xf32>
    %190 = arith.mulf %189, %185 : vector<16x64xf32>
    %191 = arith.mulf %190, %185 : vector<16x64xf32>
    %192 = arith.addf %185, %191 : vector<16x64xf32>
    %cst_63 = arith.constant 0.797884583 : f32
    %193 = vector.broadcast %cst_63 : f32 to vector<16x64xf32>
    %194 = arith.mulf %193, %192 : vector<16x64xf32>
    %195 = math.tanh %194 : vector<16x64xf32>
    %cst_64 = arith.constant 1.000000e+00 : f32
    %196 = vector.broadcast %cst_64 : f32 to vector<16x64xf32>
    %197 = arith.addf %196, %195 : vector<16x64xf32>
    %198 = arith.mulf %187, %197 : vector<16x64xf32>
    %199 = arith.truncf %198 : vector<16x64xf32> to vector<16x64xbf16>
    %c0_65 = arith.constant 0 : index
    %c0_66 = arith.constant 0 : index
    %c0_67 = arith.constant 0 : index
    %200 = vector.load %arg12[%c0_65, %c0_66, %c0_67] : memref<2x64x32xbf16, #tpu.memory_space<vmem>>, vector<1x64x32xbf16>
    %201 = vector.shape_cast %200 : vector<1x64x32xbf16> to vector<64x32xbf16>
    %cst_68 = arith.constant dense<0.000000e+00> : vector<16x32xf32>
    %202 = tpu.matmul %199, %201, %cst_68 {dimension_numbers = #tpu.dot_dimension_numbers<[1], [0], [0], [1], [0, 0, 1, 1], [], []>} : vector<16x64xbf16>, vector<64x32xbf16>, vector<16x32xf32> -> vector<16x32xf32>
    %c0_69 = arith.constant 0 : index
    %c0_70 = arith.constant 0 : index
    %c0_71 = arith.constant 0 : index
    %203 = vector.load %arg13[%c0_69, %c0_70, %c0_71] : memref<2x1x32xf32, #tpu.memory_space<vmem>>, vector<1x1x32xf32>
    %204 = vector.shape_cast %203 : vector<1x1x32xf32> to vector<1x32xf32>
    %205 = vector.broadcast %204 : vector<1x32xf32> to vector<16x32xf32>
    %206 = arith.addf %202, %205 : vector<16x32xf32>
    %207 = arith.addf %177, %206 : vector<16x32xf32>
    %c0_72 = arith.constant 0 : index
    %c0_73 = arith.constant 0 : index
    %c0_74 = arith.constant 0 : index
    %208 = vector.load %arg14[%c0_72, %c0_73, %c0_74] : memref<2x1x32xf32, #tpu.memory_space<vmem>>, vector<1x1x32xf32>
    %209 = vector.shape_cast %208 : vector<1x1x32xf32> to vector<1x32xf32>
    %c0_75 = arith.constant 0 : index
    %c0_76 = arith.constant 0 : index
    %c0_77 = arith.constant 0 : index
    %210 = vector.load %arg15[%c0_75, %c0_76, %c0_77] : memref<2x1x32xf32, #tpu.memory_space<vmem>>, vector<1x1x32xf32>
    %211 = vector.shape_cast %210 : vector<1x1x32xf32> to vector<1x32xf32>
    %cst_78 = arith.constant dense<0.000000e+00> : vector<16xf32>
    %212 = vector.multi_reduction <add>, %207, %cst_78 [1] : vector<16x32xf32> to vector<16xf32>
    %213 = vector.shape_cast %212 : vector<16xf32> to vector<16x1xf32>
    %cst_79 = arith.constant 3.200000e+01 : f32
    %214 = vector.broadcast %cst_79 : f32 to vector<16x1xf32>
    %215 = arith.divf %213, %214 : vector<16x1xf32>
    %216 = vector.broadcast %215 : vector<16x1xf32> to vector<16x32xf32>
    %217 = arith.subf %207, %216 : vector<16x32xf32>
    %218 = vector.broadcast %215 : vector<16x1xf32> to vector<16x32xf32>
    %219 = arith.subf %207, %218 : vector<16x32xf32>
    %220 = arith.mulf %217, %219 : vector<16x32xf32>
    %cst_80 = arith.constant dense<0.000000e+00> : vector<16xf32>
    %221 = vector.multi_reduction <add>, %220, %cst_80 [1] : vector<16x32xf32> to vector<16xf32>
    %222 = vector.shape_cast %221 : vector<16xf32> to vector<16x1xf32>
    %cst_81 = arith.constant 3.200000e+01 : f32
    %223 = vector.broadcast %cst_81 : f32 to vector<16x1xf32>
    %224 = arith.divf %222, %223 : vector<16x1xf32>
    %225 = vector.broadcast %215 : vector<16x1xf32> to vector<16x32xf32>
    %226 = arith.subf %207, %225 : vector<16x32xf32>
    %cst_82 = arith.constant 9.99999996E-13 : f32
    %227 = vector.broadcast %cst_82 : f32 to vector<16x1xf32>
    %228 = arith.addf %224, %227 : vector<16x1xf32>
    %229 = math.rsqrt %228 : vector<16x1xf32>
    %230 = vector.broadcast %229 : vector<16x1xf32> to vector<16x32xf32>
    %231 = arith.mulf %226, %230 : vector<16x32xf32>
    %232 = vector.broadcast %209 : vector<1x32xf32> to vector<16x32xf32>
    %233 = arith.mulf %231, %232 : vector<16x32xf32>
    %234 = vector.broadcast %211 : vector<1x32xf32> to vector<16x32xf32>
    %235 = arith.addf %233, %234 : vector<16x32xf32>
    %236 = arith.truncf %235 : vector<16x32xf32> to vector<16x32xbf16>
    %c1 = arith.constant 1 : index
    %c0_83 = arith.constant 0 : index
    %c0_84 = arith.constant 0 : index
    %237 = vector.load %arg4[%c1, %c0_83, %c0_84] : memref<2x32x96xbf16, #tpu.memory_space<vmem>>, vector<1x32x96xbf16>
    %238 = vector.shape_cast %237 : vector<1x32x96xbf16> to vector<32x96xbf16>
    %cst_85 = arith.constant dense<0.000000e+00> : vector<16x96xf32>
    %239 = tpu.matmul %236, %238, %cst_85 {dimension_numbers = #tpu.dot_dimension_numbers<[1], [0], [0], [1], [0, 0, 1, 1], [], []>} : vector<16x32xbf16>, vector<32x96xbf16>, vector<16x96xf32> -> vector<16x96xf32>
    %c1_86 = arith.constant 1 : index
    %c0_87 = arith.constant 0 : index
    %c0_88 = arith.constant 0 : index
    %240 = vector.load %arg5[%c1_86, %c0_87, %c0_88] : memref<2x1x96xf32, #tpu.memory_space<vmem>>, vector<1x1x96xf32>
    %241 = vector.shape_cast %240 : vector<1x1x96xf32> to vector<1x96xf32>
    %242 = vector.broadcast %241 : vector<1x96xf32> to vector<16x96xf32>
    %243 = arith.addf %239, %242 : vector<16x96xf32>
    %244 = vector.extract_strided_slice %243 {offsets = [0, 0], sizes = [16, 32], strides = [1, 1]} : vector<16x96xf32> to vector<16x32xf32>
    %245 = vector.extract_strided_slice %243 {offsets = [0, 32], sizes = [16, 32], strides = [1, 1]} : vector<16x96xf32> to vector<16x32xf32>
    %246 = arith.truncf %245 : vector<16x32xf32> to vector<16x32xbf16>
    %247 = vector.extract_strided_slice %243 {offsets = [0, 64], sizes = [16, 32], strides = [1, 1]} : vector<16x96xf32> to vector<16x32xf32>
    %248 = vector.broadcast %55 : vector<1x32xf32> to vector<16x32xf32>
    %249 = arith.mulf %244, %248 : vector<16x32xf32>
    %250 = arith.truncf %249 : vector<16x32xf32> to vector<16x32xbf16>
    %cst_89 = arith.constant dense<0.000000e+00> : vector<16x16xf32>
    %251 = tpu.matmul %250, %246, %cst_89 {dimension_numbers = #tpu.dot_dimension_numbers<[1], [1], [0], [0], [0, 0, 1, 0], [], []>} : vector<16x32xbf16>, vector<16x32xbf16>, vector<16x16xf32> -> vector<16x16xf32>
    %252 = vector.broadcast %62 : vector<1x32xf32> to vector<16x32xf32>
    %253 = arith.mulf %244, %252 : vector<16x32xf32>
    %254 = arith.truncf %253 : vector<16x32xf32> to vector<16x32xbf16>
    %cst_90 = arith.constant dense<0.000000e+00> : vector<16x16xf32>
    %255 = tpu.matmul %254, %246, %cst_90 {dimension_numbers = #tpu.dot_dimension_numbers<[1], [1], [0], [0], [0, 0, 1, 0], [], []>} : vector<16x32xbf16>, vector<16x32xbf16>, vector<16x16xf32> -> vector<16x16xf32>
    %256 = vector.broadcast %69 : vector<1x32xf32> to vector<16x32xf32>
    %257 = arith.mulf %244, %256 : vector<16x32xf32>
    %258 = arith.truncf %257 : vector<16x32xf32> to vector<16x32xbf16>
    %cst_91 = arith.constant dense<0.000000e+00> : vector<16x16xf32>
    %259 = tpu.matmul %258, %246, %cst_91 {dimension_numbers = #tpu.dot_dimension_numbers<[1], [1], [0], [0], [0, 0, 1, 0], [], []>} : vector<16x32xbf16>, vector<16x32xbf16>, vector<16x16xf32> -> vector<16x16xf32>
    %260 = vector.broadcast %76 : vector<1x32xf32> to vector<16x32xf32>
    %261 = arith.mulf %244, %260 : vector<16x32xf32>
    %262 = arith.truncf %261 : vector<16x32xf32> to vector<16x32xbf16>
    %cst_92 = arith.constant dense<0.000000e+00> : vector<16x16xf32>
    %263 = tpu.matmul %262, %246, %cst_92 {dimension_numbers = #tpu.dot_dimension_numbers<[1], [1], [0], [0], [0, 0, 1, 0], [], []>} : vector<16x32xbf16>, vector<16x32xbf16>, vector<16x16xf32> -> vector<16x16xf32>
    %264 = tpu.concatenate %251, %255, %259, %263 in 0 : vector<16x16xf32>, vector<16x16xf32>, vector<16x16xf32>, vector<16x16xf32> -> vector<64x16xf32>
    %265 = arith.addf %264, %47 : vector<64x16xf32>
    %cst_93 = arith.constant dense<0xFF800000> : vector<64xf32>
    %266 = vector.multi_reduction <maximumf>, %265, %cst_93 [1] : vector<64x16xf32> to vector<64xf32>
    %267 = vector.shape_cast %266 : vector<64xf32> to vector<64x1xf32>
    %268 = vector.broadcast %267 : vector<64x1xf32> to vector<64x16xf32>
    %269 = arith.subf %265, %268 : vector<64x16xf32>
    %270 = math.exp %269 : vector<64x16xf32>
    %cst_94 = arith.constant dense<0.000000e+00> : vector<64xf32>
    %271 = vector.multi_reduction <add>, %270, %cst_94 [1] : vector<64x16xf32> to vector<64xf32>
    %272 = vector.shape_cast %271 : vector<64xf32> to vector<64x1xf32>
    %273 = tpu.reciprocal %272 {approx = true} : vector<64x1xf32> -> vector<64x1xf32>
    %274 = vector.broadcast %273 : vector<64x1xf32> to vector<64x16xf32>
    %275 = arith.mulf %270, %274 : vector<64x16xf32>
    %276 = arith.truncf %275 : vector<64x16xf32> to vector<64x16xbf16>
    %277 = vector.extract_strided_slice %276 {offsets = [0, 0], sizes = [16, 16], strides = [1, 1]} : vector<64x16xbf16> to vector<16x16xbf16>
    %278 = vector.broadcast %55 : vector<1x32xf32> to vector<16x32xf32>
    %279 = arith.mulf %247, %278 : vector<16x32xf32>
    %280 = arith.truncf %279 : vector<16x32xf32> to vector<16x32xbf16>
    %cst_95 = arith.constant dense<0.000000e+00> : vector<16x32xf32>
    %281 = tpu.matmul %277, %280, %cst_95 {dimension_numbers = #tpu.dot_dimension_numbers<[1], [0], [0], [1], [0, 0, 1, 1], [], []>} : vector<16x16xbf16>, vector<16x32xbf16>, vector<16x32xf32> -> vector<16x32xf32>
    %282 = vector.extract_strided_slice %276 {offsets = [16, 0], sizes = [16, 16], strides = [1, 1]} : vector<64x16xbf16> to vector<16x16xbf16>
    %283 = vector.broadcast %62 : vector<1x32xf32> to vector<16x32xf32>
    %284 = arith.mulf %247, %283 : vector<16x32xf32>
    %285 = arith.truncf %284 : vector<16x32xf32> to vector<16x32xbf16>
    %cst_96 = arith.constant dense<0.000000e+00> : vector<16x32xf32>
    %286 = tpu.matmul %282, %285, %cst_96 {dimension_numbers = #tpu.dot_dimension_numbers<[1], [0], [0], [1], [0, 0, 1, 1], [], []>} : vector<16x16xbf16>, vector<16x32xbf16>, vector<16x32xf32> -> vector<16x32xf32>
    %287 = arith.addf %281, %286 : vector<16x32xf32>
    %288 = vector.extract_strided_slice %276 {offsets = [32, 0], sizes = [16, 16], strides = [1, 1]} : vector<64x16xbf16> to vector<16x16xbf16>
    %289 = vector.broadcast %69 : vector<1x32xf32> to vector<16x32xf32>
    %290 = arith.mulf %247, %289 : vector<16x32xf32>
    %291 = arith.truncf %290 : vector<16x32xf32> to vector<16x32xbf16>
    %cst_97 = arith.constant dense<0.000000e+00> : vector<16x32xf32>
    %292 = tpu.matmul %288, %291, %cst_97 {dimension_numbers = #tpu.dot_dimension_numbers<[1], [0], [0], [1], [0, 0, 1, 1], [], []>} : vector<16x16xbf16>, vector<16x32xbf16>, vector<16x32xf32> -> vector<16x32xf32>
    %293 = arith.addf %287, %292 : vector<16x32xf32>
    %294 = vector.extract_strided_slice %276 {offsets = [48, 0], sizes = [16, 16], strides = [1, 1]} : vector<64x16xbf16> to vector<16x16xbf16>
    %295 = vector.broadcast %76 : vector<1x32xf32> to vector<16x32xf32>
    %296 = arith.mulf %247, %295 : vector<16x32xf32>
    %297 = arith.truncf %296 : vector<16x32xf32> to vector<16x32xbf16>
    %cst_98 = arith.constant dense<0.000000e+00> : vector<16x32xf32>
    %298 = tpu.matmul %294, %297, %cst_98 {dimension_numbers = #tpu.dot_dimension_numbers<[1], [0], [0], [1], [0, 0, 1, 1], [], []>} : vector<16x16xbf16>, vector<16x32xbf16>, vector<16x32xf32> -> vector<16x32xf32>
    %299 = arith.addf %293, %298 : vector<16x32xf32>
    %300 = arith.truncf %299 : vector<16x32xf32> to vector<16x32xbf16>
    %c1_99 = arith.constant 1 : index
    %c0_100 = arith.constant 0 : index
    %c0_101 = arith.constant 0 : index
    %301 = vector.load %arg6[%c1_99, %c0_100, %c0_101] : memref<2x32x32xbf16, #tpu.memory_space<vmem>>, vector<1x32x32xbf16>
    %302 = vector.shape_cast %301 : vector<1x32x32xbf16> to vector<32x32xbf16>
    %cst_102 = arith.constant dense<0.000000e+00> : vector<16x32xf32>
    %303 = tpu.matmul %300, %302, %cst_102 {dimension_numbers = #tpu.dot_dimension_numbers<[1], [0], [0], [1], [0, 0, 1, 1], [], []>} : vector<16x32xbf16>, vector<32x32xbf16>, vector<16x32xf32> -> vector<16x32xf32>
    %c1_103 = arith.constant 1 : index
    %c0_104 = arith.constant 0 : index
    %c0_105 = arith.constant 0 : index
    %304 = vector.load %arg7[%c1_103, %c0_104, %c0_105] : memref<2x1x32xf32, #tpu.memory_space<vmem>>, vector<1x1x32xf32>
    %305 = vector.shape_cast %304 : vector<1x1x32xf32> to vector<1x32xf32>
    %306 = vector.broadcast %305 : vector<1x32xf32> to vector<16x32xf32>
    %307 = arith.addf %303, %306 : vector<16x32xf32>
    %308 = arith.addf %235, %307 : vector<16x32xf32>
    %c1_106 = arith.constant 1 : index
    %c0_107 = arith.constant 0 : index
    %c0_108 = arith.constant 0 : index
    %309 = vector.load %arg8[%c1_106, %c0_107, %c0_108] : memref<2x1x32xf32, #tpu.memory_space<vmem>>, vector<1x1x32xf32>
    %310 = vector.shape_cast %309 : vector<1x1x32xf32> to vector<1x32xf32>
    %c1_109 = arith.constant 1 : index
    %c0_110 = arith.constant 0 : index
    %c0_111 = arith.constant 0 : index
    %311 = vector.load %arg9[%c1_109, %c0_110, %c0_111] : memref<2x1x32xf32, #tpu.memory_space<vmem>>, vector<1x1x32xf32>
    %312 = vector.shape_cast %311 : vector<1x1x32xf32> to vector<1x32xf32>
    %cst_112 = arith.constant dense<0.000000e+00> : vector<16xf32>
    %313 = vector.multi_reduction <add>, %308, %cst_112 [1] : vector<16x32xf32> to vector<16xf32>
    %314 = vector.shape_cast %313 : vector<16xf32> to vector<16x1xf32>
    %cst_113 = arith.constant 3.200000e+01 : f32
    %315 = vector.broadcast %cst_113 : f32 to vector<16x1xf32>
    %316 = arith.divf %314, %315 : vector<16x1xf32>
    %317 = vector.broadcast %316 : vector<16x1xf32> to vector<16x32xf32>
    %318 = arith.subf %308, %317 : vector<16x32xf32>
    %319 = vector.broadcast %316 : vector<16x1xf32> to vector<16x32xf32>
    %320 = arith.subf %308, %319 : vector<16x32xf32>
    %321 = arith.mulf %318, %320 : vector<16x32xf32>
    %cst_114 = arith.constant dense<0.000000e+00> : vector<16xf32>
    %322 = vector.multi_reduction <add>, %321, %cst_114 [1] : vector<16x32xf32> to vector<16xf32>
    %323 = vector.shape_cast %322 : vector<16xf32> to vector<16x1xf32>
    %cst_115 = arith.constant 3.200000e+01 : f32
    %324 = vector.broadcast %cst_115 : f32 to vector<16x1xf32>
    %325 = arith.divf %323, %324 : vector<16x1xf32>
    %326 = vector.broadcast %316 : vector<16x1xf32> to vector<16x32xf32>
    %327 = arith.subf %308, %326 : vector<16x32xf32>
    %cst_116 = arith.constant 9.99999996E-13 : f32
    %328 = vector.broadcast %cst_116 : f32 to vector<16x1xf32>
    %329 = arith.addf %325, %328 : vector<16x1xf32>
    %330 = math.rsqrt %329 : vector<16x1xf32>
    %331 = vector.broadcast %330 : vector<16x1xf32> to vector<16x32xf32>
    %332 = arith.mulf %327, %331 : vector<16x32xf32>
    %333 = vector.broadcast %310 : vector<1x32xf32> to vector<16x32xf32>
    %334 = arith.mulf %332, %333 : vector<16x32xf32>
    %335 = vector.broadcast %312 : vector<1x32xf32> to vector<16x32xf32>
    %336 = arith.addf %334, %335 : vector<16x32xf32>
    %337 = arith.truncf %336 : vector<16x32xf32> to vector<16x32xbf16>
    %c1_117 = arith.constant 1 : index
    %c0_118 = arith.constant 0 : index
    %c0_119 = arith.constant 0 : index
    %338 = vector.load %arg10[%c1_117, %c0_118, %c0_119] : memref<2x32x64xbf16, #tpu.memory_space<vmem>>, vector<1x32x64xbf16>
    %339 = vector.shape_cast %338 : vector<1x32x64xbf16> to vector<32x64xbf16>
    %cst_120 = arith.constant dense<0.000000e+00> : vector<16x64xf32>
    %340 = tpu.matmul %337, %339, %cst_120 {dimension_numbers = #tpu.dot_dimension_numbers<[1], [0], [0], [1], [0, 0, 1, 1], [], []>} : vector<16x32xbf16>, vector<32x64xbf16>, vector<16x64xf32> -> vector<16x64xf32>
    %c1_121 = arith.constant 1 : index
    %c0_122 = arith.constant 0 : index
    %c0_123 = arith.constant 0 : index
    %341 = vector.load %arg11[%c1_121, %c0_122, %c0_123] : memref<2x1x64xf32, #tpu.memory_space<vmem>>, vector<1x1x64xf32>
    %342 = vector.shape_cast %341 : vector<1x1x64xf32> to vector<1x64xf32>
    %343 = vector.broadcast %342 : vector<1x64xf32> to vector<16x64xf32>
    %344 = arith.addf %340, %343 : vector<16x64xf32>
    %cst_124 = arith.constant 5.000000e-01 : f32
    %345 = vector.broadcast %cst_124 : f32 to vector<16x64xf32>
    %346 = arith.mulf %345, %344 : vector<16x64xf32>
    %cst_125 = arith.constant 4.471500e-02 : f32
    %347 = vector.broadcast %cst_125 : f32 to vector<16x64xf32>
    %348 = arith.mulf %347, %344 : vector<16x64xf32>
    %349 = arith.mulf %348, %344 : vector<16x64xf32>
    %350 = arith.mulf %349, %344 : vector<16x64xf32>
    %351 = arith.addf %344, %350 : vector<16x64xf32>
    %cst_126 = arith.constant 0.797884583 : f32
    %352 = vector.broadcast %cst_126 : f32 to vector<16x64xf32>
    %353 = arith.mulf %352, %351 : vector<16x64xf32>
    %354 = math.tanh %353 : vector<16x64xf32>
    %cst_127 = arith.constant 1.000000e+00 : f32
    %355 = vector.broadcast %cst_127 : f32 to vector<16x64xf32>
    %356 = arith.addf %355, %354 : vector<16x64xf32>
    %357 = arith.mulf %346, %356 : vector<16x64xf32>
    %358 = arith.truncf %357 : vector<16x64xf32> to vector<16x64xbf16>
    %c1_128 = arith.constant 1 : index
    %c0_129 = arith.constant 0 : index
    %c0_130 = arith.constant 0 : index
    %359 = vector.load %arg12[%c1_128, %c0_129, %c0_130] : memref<2x64x32xbf16, #tpu.memory_space<vmem>>, vector<1x64x32xbf16>
    %360 = vector.shape_cast %359 : vector<1x64x32xbf16> to vector<64x32xbf16>
    %cst_131 = arith.constant dense<0.000000e+00> : vector<16x32xf32>
    %361 = tpu.matmul %358, %360, %cst_131 {dimension_numbers = #tpu.dot_dimension_numbers<[1], [0], [0], [1], [0, 0, 1, 1], [], []>} : vector<16x64xbf16>, vector<64x32xbf16>, vector<16x32xf32> -> vector<16x32xf32>
    %c1_132 = arith.constant 1 : index
    %c0_133 = arith.constant 0 : index
    %c0_134 = arith.constant 0 : index
    %362 = vector.load %arg13[%c1_132, %c0_133, %c0_134] : memref<2x1x32xf32, #tpu.memory_space<vmem>>, vector<1x1x32xf32>
    %363 = vector.shape_cast %362 : vector<1x1x32xf32> to vector<1x32xf32>
    %364 = vector.broadcast %363 : vector<1x32xf32> to vector<16x32xf32>
    %365 = arith.addf %361, %364 : vector<16x32xf32>
    %366 = arith.addf %336, %365 : vector<16x32xf32>
    %c1_135 = arith.constant 1 : index
    %c0_136 = arith.constant 0 : index
    %c0_137 = arith.constant 0 : index
    %367 = vector.load %arg14[%c1_135, %c0_136, %c0_137] : memref<2x1x32xf32, #tpu.memory_space<vmem>>, vector<1x1x32xf32>
    %368 = vector.shape_cast %367 : vector<1x1x32xf32> to vector<1x32xf32>
    %c1_138 = arith.constant 1 : index
    %c0_139 = arith.constant 0 : index
    %c0_140 = arith.constant 0 : index
    %369 = vector.load %arg15[%c1_138, %c0_139, %c0_140] : memref<2x1x32xf32, #tpu.memory_space<vmem>>, vector<1x1x32xf32>
    %370 = vector.shape_cast %369 : vector<1x1x32xf32> to vector<1x32xf32>
    %cst_141 = arith.constant dense<0.000000e+00> : vector<16xf32>
    %371 = vector.multi_reduction <add>, %366, %cst_141 [1] : vector<16x32xf32> to vector<16xf32>
    %372 = vector.shape_cast %371 : vector<16xf32> to vector<16x1xf32>
    %cst_142 = arith.constant 3.200000e+01 : f32
    %373 = vector.broadcast %cst_142 : f32 to vector<16x1xf32>
    %374 = arith.divf %372, %373 : vector<16x1xf32>
    %375 = vector.broadcast %374 : vector<16x1xf32> to vector<16x32xf32>
    %376 = arith.subf %366, %375 : vector<16x32xf32>
    %377 = vector.broadcast %374 : vector<16x1xf32> to vector<16x32xf32>
    %378 = arith.subf %366, %377 : vector<16x32xf32>
    %379 = arith.mulf %376, %378 : vector<16x32xf32>
    %cst_143 = arith.constant dense<0.000000e+00> : vector<16xf32>
    %380 = vector.multi_reduction <add>, %379, %cst_143 [1] : vector<16x32xf32> to vector<16xf32>
    %381 = vector.shape_cast %380 : vector<16xf32> to vector<16x1xf32>
    %cst_144 = arith.constant 3.200000e+01 : f32
    %382 = vector.broadcast %cst_144 : f32 to vector<16x1xf32>
    %383 = arith.divf %381, %382 : vector<16x1xf32>
    %384 = vector.broadcast %374 : vector<16x1xf32> to vector<16x32xf32>
    %385 = arith.subf %366, %384 : vector<16x32xf32>
    %cst_145 = arith.constant 9.99999996E-13 : f32
    %386 = vector.broadcast %cst_145 : f32 to vector<16x1xf32>
    %387 = arith.addf %383, %386 : vector<16x1xf32>
    %388 = math.rsqrt %387 : vector<16x1xf32>
    %389 = vector.broadcast %388 : vector<16x1xf32> to vector<16x32xf32>
    %390 = arith.mulf %385, %389 : vector<16x32xf32>
    %391 = vector.broadcast %368 : vector<1x32xf32> to vector<16x32xf32>
    %392 = arith.mulf %390, %391 : vector<16x32xf32>
    %393 = vector.broadcast %370 : vector<1x32xf32> to vector<16x32xf32>
    %394 = arith.addf %392, %393 : vector<16x32xf32>
    %395 = arith.truncf %394 : vector<16x32xf32> to vector<16x32xbf16>
    %c0_146 = arith.constant 0 : index
    %c0_147 = arith.constant 0 : index
    %396 = vector.load %arg16[%c0_146, %c0_147] : memref<32x32xbf16, #tpu.memory_space<vmem>>, vector<32x32xbf16>
    %cst_148 = arith.constant dense<0.000000e+00> : vector<16x32xf32>
    %397 = tpu.matmul %395, %396, %cst_148 {dimension_numbers = #tpu.dot_dimension_numbers<[1], [0], [0], [1], [0, 0, 1, 1], [], []>} : vector<16x32xbf16>, vector<32x32xbf16>, vector<16x32xf32> -> vector<16x32xf32>
    %c0_149 = arith.constant 0 : index
    %c0_150 = arith.constant 0 : index
    %398 = vector.load %arg17[%c0_149, %c0_150] : memref<1x32xf32, #tpu.memory_space<vmem>>, vector<1x32xf32>
    %399 = vector.broadcast %398 : vector<1x32xf32> to vector<16x32xf32>
    %400 = arith.addf %397, %399 : vector<16x32xf32>
    %401 = math.tanh %400 : vector<16x32xf32>
    %402 = arith.truncf %401 : vector<16x32xf32> to vector<16x32xbf16>
    %c0_151 = arith.constant 0 : index
    %c0_152 = arith.constant 0 : index
    %403 = vector.load %arg18[%c0_151, %c0_152] : memref<32x1xbf16, #tpu.memory_space<vmem>>, vector<32x1xbf16>
    %cst_153 = arith.constant dense<0.000000e+00> : vector<16x1xf32>
    %404 = tpu.matmul %402, %403, %cst_153 {dimension_numbers = #tpu.dot_dimension_numbers<[1], [0], [0], [1], [0, 0, 1, 1], [], []>} : vector<16x32xbf16>, vector<32x1xbf16>, vector<16x1xf32> -> vector<16x1xf32>
    %c0_154 = arith.constant 0 : index
    %c0_155 = arith.constant 0 : index
    %405 = vector.load %arg19[%c0_154, %c0_155] : memref<1x1xf32, #tpu.memory_space<vmem>>, vector<1x1xf32>
    %406 = vector.broadcast %405 : vector<1x1xf32> to vector<16x1xf32>
    %407 = arith.addf %404, %406 : vector<16x1xf32>
    %c0_156 = arith.constant 0 : index
    %c0_157 = arith.constant 0 : index
    %408 = vector.load %arg20[%c0_156, %c0_157] : memref<16x1xf32, #tpu.memory_space<vmem>>, vector<16x1xf32>
    tpu.vector_store %arg20[%c0_156, %c0_157], %407 {strides = array<i32>} : memref<16x1xf32, #tpu.memory_space<vmem>>, vector<16x1xf32>,
    return
  }
}

</mosaic_0001>

<bundles_post_ra>
// kernel: bert_model_forward.1
= control target key start
LH: loop header
LB: loop body
LE: loop exit
PB: predicated region body
PF: predicated region fallthrough
CT: control target
= control target key end

     0   :  { %vm72_vm0 = vcmask 261120   ;;  %v2618_v14 = vmov 0.0   ;;  %vm2619_vm1 = vmmov 0   ;;  %v116_v42 = vlaneseq  ;;  %s3236_s0 = inlined_call_operand.vmem [shape: f32[16,32], index: 0, kind: input, shape index: {}]   ;;  %s3237_s4 = inlined_call_operand.vmem [shape: bf16[2,32,96], index: 4, kind: input, shape index: {}]   ;;  %s3238_s2 = inlined_call_operand.vmem [shape: f32[1,32], index: 2, kind: input, shape index: {}]   ;;  %s3239_s3 = inlined_call_operand.vmem [shape: f32[1,32], index: 3, kind: input, shape index: {}]   ;;  %s3240_s5 = inlined_call_operand.vmem [shape: f32[2,1,96], index: 5, kind: input, shape index: {}]   ;;  %s3241_s1 = inlined_call_operand.vmem [shape: f32[1,16], index: 1, kind: input, shape index: {}]   ;;  %s3242_s6 = inlined_call_operand.vmem [shape: bf16[2,32,32], index: 6, kind: input, shape index: {}]   ;;  %s3243_s7 = inlined_call_operand.vmem [shape: f32[2,1,32], index: 7, kind: input, shape index: {}]   ;;  %s3244_s10 = inlined_call_operand.vmem [shape: bf16[2,32,64], index: 10, kind: input, shape index: {}]   ;;  %s3245_s8 = inlined_call_operand.vmem [shape: f32[2,1,32], index: 8, kind: input, shape index: {}]   ;;  %s3246_s9 = inlined_call_operand.vmem [shape: f32[2,1,32], index: 9, kind: input, shape index: {}]   ;;  %s3247_s12 = inlined_call_operand.vmem [shape: bf16[2,64,32], index: 12, kind: input, shape index: {}]   ;;  %s3248_s11 = inlined_call_operand.vmem [shape: f32[2,1,64], index: 11, kind: input, shape index: {}]   ;;  %s3249_s13 = inlined_call_operand.vmem [shape: f32[2,1,32], index: 13, kind: input, shape index: {}]   ;;  %s3250_s14 = inlined_call_operand.vmem [shape: f32[2,1,32], index: 14, kind: input, shape index: {}]   ;;  %s3251_s15 = inlined_call_operand.vmem [shape: f32[2,1,32], index: 15, kind: input, shape index: {}]   ;;  %s3252_s16 = inlined_call_operand.vmem [shape: bf16[32,32], index: 16, kind: input, shape index: {}]   ;;  %s3253_s18 = inlined_call_operand.vmem [shape: bf16[32,1], index: 18, kind: input, shape index: {}]   ;;  %s3254_s19 = inlined_call_operand.<no memory space> [shape: f32[1,1], index: 19, kind: input, shape index: {}]   ;;  %s3255_s17 = inlined_call_operand.vmem [shape: f32[1,32], index: 17, kind: input, shape index: {}]   ;;  %s3256_s20 = inlined_call_operand.vmem [shape: f32[16,1], index: 20, kind: output, shape index: {}]  }
   0x1   :  { %3260 = sst [smem:[#allocation3_spill]] %s3236_s0  ;;  %2310 = vmatprep.subr.bf16.mxu0 %v2618_v14  ;;  %2314 = vmatprep.mubr.msk.bf16.mxu0 %vm2619_vm1, %v2618_v14  ;;  %vm435_vm13 = vcmask 130048   ;;  %vm992_vm15 = vcmask 523264  }
   0x2   :  { %3261 = sst [smem:[#allocation4_spill]] %s3237_s4  ;;  %2318 = vmatprep.subr.bf16.mxu1 %v2618_v14  ;;  %2320 = vmatprep.mubr.msk.bf16.mxu1 %vm2619_vm1, %v2618_v14  ;;  %v122_v43 = vand.u32 127, %v116_v42  ;;  %v117_v62 = vshrl.u32 %v116_v42, 7 }
   0x3   :  { %3262 = sst [smem:[#allocation5_spill]] %s3238_s2  ;;  %s2620_s2 = smov 96  }
   0x4   :  { %3263 = sst [smem:[#allocation6_spill]] %s3239_s3  ;;  %vm149_vm2 = vcmp.ge.s32.totalorder %v122_v43, 8  ;;  %vm150_vm3 = vcmp.lt.s32.totalorder %v122_v43, 16  ;;  %vm145_vm4 = vcmp.lt.s32.totalorder %v122_v43, 8  ;;  %vm154_vm6 = vcmp.ge.s32.totalorder %v122_v43, 16 }
   0x5   :  { %3264 = sst [smem:[#allocation7_spill]] %s3240_s5  ;;  %vm151_vm5 = vmand %vm149_vm2, %vm150_vm3  ;;  %v2778_v46 = vsel %vm145_vm4, 1.0, %v2618_v14  ;;  %vm155_vm7 = vcmp.lt.s32.totalorder %v122_v43, 24  ;;  %vm159_vm8 = vcmp.ge.s32.totalorder %v122_v43, 24  ;;  %vm160_vm9 = vcmp.lt.s32.totalorder %v122_v43, 32 }
   0x6   :  { %s3265_s23 = sld [smem:[#allocation3_spill]]  ;;  %v2781_v47 = vsel %vm151_vm5, 1.0, %v2618_v14  ;;  %vm156_vm10 = vmand %vm154_vm6, %vm155_vm7  ;;  %v119_v63 = vcvt.s32.f32 %v117_v62 }
   0x7   :  { %s3266_s26 = sld [smem:[#allocation4_spill]]  ;;  %vm161_vm11 = vmand %vm159_vm8, %vm160_vm9  ;;  %v2796_v54 = vsel %vm156_vm10, 1.0, %v2618_v14 }
   0x8   :  { %s3267_s30 = sld [smem:[#allocation5_spill]]  ;;  %v2799_v55 = vsel %vm161_vm11, 1.0, %v2618_v14 }
   0x9   :  { %s3268_s4 = sld [smem:[#allocation6_spill]] }
   0xa   :  { %s3269_s24 = sld [smem:[#allocation7_spill]] }
   0xc   :  { %v68_v0 = vld [vmem:[%s3265_s23] sm:$0xff]  ;;  %v69_v1 = vld [vmem:[%s3265_s23 + $0x8] sm:$0xff] }
   0xd   :  { %v73_v2 = vsel %vm72_vm0, %v68_v0, 0.0  ;;  %v76_v3 = vsel %vm72_vm0, %v69_v1, 0.0  ;;  %v2498_v15 = vld [vmem:[%s3266_s26 + $0x8] sm:$0xff]   ;;  %v2499_v16 = vld [vmem:[%s3266_s26] sm:$0xff]  }
   0xe   :  { %74 = vadd.xlane.f32.xlu0 %v73_v2  ;;  %2311 = vmatpush3.bf16.msra.mxu0 %v2498_v15  ;;  %v2141_v25 = vld [vmem:[%s3267_s30] ss:$0 sm:$0xff]  ;;  %v124_v2 = vadd.f32 0.5, %v119_v63 }
   0xf   :  { %2312 = vmatprep.subr.bf16.mxu0 %v2618_v14  ;;  %v2142_v29 = vld [vmem:[%s3268_s4] ss:$0 sm:$0xff] }
  0x10   :  { %v2148_v35 = vld [vmem:[%s3269_s24] ss:$0 sm:$0xff] }
  0x12   :  { %77 = vadd.xlane.f32.xlu0 %v76_v3  ;;  %2313 = vmatpush3.bf16.msra.mxu0 %v2499_v16 }
  0x13   :  { %2324 = vmatprep.subr.bf16.mxu0 %v2618_v14 }
  0x97   :  { %v75_v4 = vpop.xlane.xlu0 %74 }
  0x98   :  { %v80_v5 = vmul.f32 0.03125, %v75_v4 }
  0x9a   :  { %v82_v6 = vsub.f32 %v68_v0, %v80_v5  ;;  %v123_v0 = vcvt.s32.f32 %v122_v43  ;;  %v126_v5 = vmul.f32 0.125, %v124_v2 }
  0x9b   :  { %v78_v7 = vpop.xlane.xlu0 %77 }
  0x9c   :  { %v81_v8 = vmul.f32 0.03125, %v78_v7  ;;  %v84_v9 = vmul.f32 %v82_v6, %v82_v6  ;;  %v130_v3 = vadd.f32 0.5, %v123_v0 }
  0x9e   :  { %v83_v10 = vsub.f32 %v69_v1, %v81_v8  ;;  %v86_v11 = vsel %vm72_vm0, %v84_v9, 0.0  ;;  %v118_v1 = vadd.s32 8, %v117_v62  ;;  %v128_v8 = vfloor.f32 %v126_v5 }
  0x9f   :  { %87 = vadd.xlane.f32.xlu1 %v86_v11  ;;  %v2143_v11 = vld [vmem:[%s3241_s1] ss:$0 sm:$0xff]  ;;  %s2621_s1 = smov 64  }
  0xa0   :  { %v85_v12 = vmul.f32 %v83_v10, %v83_v10  ;;  %v120_v4 = vcvt.s32.f32 %v118_v1 }
  0xa2   :  { %v89_v13 = vsel %vm72_vm0, %v85_v12, 0.0  ;;  %v125_v7 = vadd.f32 0.5, %v120_v4 }
  0xa3   :  { %90 = vadd.xlane.f32.xlu1 %v89_v13 }
 0x128   :  { %v88_v17 = vpop.xlane.xlu1 %87 }
 0x129   :  { %v92_v18 = vmul.f32 0.03125, %v88_v17 }
 0x12b   :  { %v94_v19 = vadd.f32 1e-12, %v92_v18 }
 0x12c   :  { %v91_v20 = vpop.xlane.xlu1 %90 }
 0x12d   :  { %2522 = vrsqrt.f32 %v94_v19  ;;  %v93_v21 = vmul.f32 0.03125, %v91_v20 }
 0x12f   :  { %v95_v22 = vadd.f32 1e-12, %v93_v21 }
 0x131   :  { %2524 = vrsqrt.f32 %v95_v22 }
 0x13a   :  { %v2523_v23 = vpop.eup %2522 }
 0x13b   :  { %v98_v24 = vmul.f32 %v2523_v23, %v82_v6  ;;  %v131_v6 = vmul.f32 0.125, %v130_v3 }
 0x13d   :  { %v106_v28 = vmul.f32 %v2141_v25, %v98_v24  ;;  %v132_v9 = vfloor.f32 %v131_v6 }
 0x13e   :  { %v2525_v26 = vpop.eup %2524 }
 0x13f   :  { %v99_v27 = vmul.f32 %v2525_v26, %v83_v10  ;;  %v2757_v31 = vadd.f32 %v2142_v29, %v106_v28  ;;  %v127_v10 = vmul.f32 0.125, %v125_v7  ;;  %vm133_vm12 = vcmp.eq.f32.partialorder %v128_v8, %v132_v9 }
 0x140   :  { %v2824_v13 = vsel %vm133_vm12, %v2143_v11, -1e+09 }
 0x141   :  { %v107_v30 = vmul.f32 %v2141_v25, %v99_v27  ;;  %v129_v12 = vfloor.f32 %v127_v10 }
 0x143   :  { %v2759_v32 = vadd.f32 %v2142_v29, %v107_v30  ;;  %vm134_vm14 = vcmp.eq.f32.partialorder %v129_v12, %v132_v9 }
 0x144   :  { %v2829_v22 = vsel %vm134_vm14, %v2143_v11, -1e+09 }
 0x145   :  { %v164_v33 = vpack.c.bf16 %v2759_v32, %v2757_v31 }
 0x147   :  { %2315 = vmatmul.mubr.msk.bf16.vlgmr.msra.gmra.mxu0 %vm72_vm0, %v164_v33 }
 0x148   :  { %2326 = vmatprep.mubr.msk.bf16.mxu0 %vm2619_vm1, %v2618_v14 }
 0x207   :  { %v225_v34 = vpop.f32.mrf.mxu0 }
 0x208   :  { %v2769_v38 = vadd.f32 %v2148_v35, %v225_v34 }
 0x209   :  { %v2316_v36 = vpop.f32.mrf.mxu0 }
 0x20a   :  { %v233_v50 = vmul.f32 %v2778_v46, %v2769_v38  ;;  %v286_v51 = vmul.f32 %v2781_v47, %v2769_v38  ;;  %v333_v58 = vmul.f32 %v2796_v54, %v2769_v38  ;;  %v380_v59 = vmul.f32 %v2799_v55, %v2769_v38 }
 0x20b   :  { %v228_v37 = vpop.f32.mrf.mxu0 }
 0x20c   :  { %v2771_v39 = vadd.f32 %v2148_v35, %v228_v37 }
 0x20d   :  { %v2317_v40 = vpop.f32.mrf.mxu0 }
 0x20e   :  { %v232_v41 = vpack.c.bf16 %v2771_v39, %v2769_v38  ;;  %v234_v48 = vmul.f32 %v2778_v46, %v2771_v39  ;;  %v287_v49 = vmul.f32 %v2781_v47, %v2771_v39  ;;  %v334_v56 = vmul.f32 %v2796_v54, %v2771_v39 }
 0x20f   :  { %v381_v57 = vmul.f32 %v2799_v55, %v2771_v39 }
 0x210   :  { %237 = vrot.lane.b32.xlu0 %v232_v41, %s2620_s2  ;;  %v235_v52 = vpack.c.bf16 %v234_v48, %v233_v50  ;;  %v288_v53 = vpack.c.bf16 %v287_v49, %v286_v51  ;;  %v335_v60 = vpack.c.bf16 %v334_v56, %v333_v58 }
 0x211   :  { %v382_v61 = vpack.c.bf16 %v381_v57, %v380_v59 }
 0x282   :  { %v238_v44 = vpop.permute.xlu0 %237 }
 0x283   :  { %v243_v45 = vsel %vm72_vm0, %v238_v44, 0 }
 0x284   :  { %2319 = vmatpush3.bf16.xpose.msra.mxu1 %v243_v45  ;;  %2325 = vmatpush3.bf16.xpose.msra.mxu0 %v243_v45 }
 0x285   :  { %2330 = vmatprep.subr.bf16.mxu1 %v2618_v14  ;;  %2336 = vmatprep.subr.bf16.mxu0 %v2618_v14 }
 0x28b   :  { %2321 = vmatmul.mubr.msk.bf16.vlgmr.msra.gmra.mxu1 %vm72_vm0, %v235_v52  ;;  %2327 = vmatmul.mubr.msk.bf16.vlgmr.msra.gmra.mxu0 %vm72_vm0, %v288_v53 }
 0x28c   :  { %2331 = vmatpush3.bf16.xpose.msra.mxu1 %v243_v45  ;;  %2337 = vmatpush3.bf16.xpose.msra.mxu0 %v243_v45 }
 0x28d   :  { %2332 = vmatprep.mubr.msk.bf16.mxu1 %vm2619_vm1, %v2618_v14  ;;  %2338 = vmatprep.mubr.msk.bf16.mxu0 %vm2619_vm1, %v2618_v14 }
 0x28e   :  { %2342 = vmatprep.subr.bf16.mxu1 %v2618_v14  ;;  %2348 = vmatprep.subr.bf16.mxu0 %v2618_v14 }
 0x293   :  { %2333 = vmatmul.mubr.msk.bf16.vlgmr.msra.gmra.mxu1 %vm72_vm0, %v335_v60  ;;  %2339 = vmatmul.mubr.msk.bf16.vlgmr.msra.gmra.mxu0 %vm72_vm0, %v382_v61 }
 0x294   :  { %2344 = vmatprep.mubr.msk.bf16.mxu1 %vm2619_vm1, %v2618_v14  ;;  %2350 = vmatprep.mubr.msk.bf16.mxu0 %vm2619_vm1, %v2618_v14 }
 0x34b   :  { %v279_v15 = vpop.f32.mrf.mxu1  ;;  %v326_v16 = vpop.f32.mrf.mxu0 }
 0x34c   :  { %v429_v17 = vadd.f32 %v326_v16, %v2824_v13  ;;  %v427_v20 = vadd.f32 %v279_v15, %v2824_v13 }
 0x34d   :  { %v2322_v18 = vpop.f32.mrf.mxu1  ;;  %v2328_v19 = vpop.f32.mrf.mxu0 }
 0x34e   :  { %v442_v21 = vsel %vm435_vm13, %v429_v17, -inf  ;;  %v436_v28 = vsel %vm435_vm13, %v427_v20, -inf }
 0x34f   :  { %v282_v23 = vpop.f32.mrf.mxu1  ;;  %443 = vmax.xlane.f32.xlu1 %v442_v21  ;;  %v329_v24 = vpop.f32.mrf.mxu0 }
 0x350   :  { %v430_v27 = vadd.f32 %v329_v24, %v2829_v22  ;;  %v428_v36 = vadd.f32 %v282_v23, %v2829_v22 }
 0x351   :  { %v2323_v25 = vpop.f32.mrf.mxu1  ;;  %v2329_v26 = vpop.f32.mrf.mxu0 }
 0x352   :  { %v445_v37 = vsel %vm435_vm13, %v430_v27, -inf  ;;  %v439_v48 = vsel %vm435_vm13, %v428_v36, -inf }
 0x353   :  { %v373_v29 = vpop.f32.mrf.mxu1  ;;  %437 = vmax.xlane.f32.xlu1 %v436_v28  ;;  %v420_v30 = vpop.f32.mrf.mxu0 }
 0x354   :  { %v433_v33 = vadd.f32 %v420_v30, %v2824_v13  ;;  %v431_v45 = vadd.f32 %v373_v29, %v2824_v13 }
 0x355   :  { %v2334_v34 = vpop.f32.mrf.mxu1  ;;  %v2340_v35 = vpop.f32.mrf.mxu0 }
 0x356   :  { %v454_v40 = vsel %vm435_vm13, %v433_v33, -inf  ;;  %v448_v49 = vsel %vm435_vm13, %v431_v45, -inf }
 0x357   :  { %v376_v41 = vpop.f32.mrf.mxu1  ;;  %446 = vmax.xlane.f32.xlu1 %v445_v37  ;;  %455 = vmax.xlane.f32.xlu0 %v454_v40  ;;  %v423_v42 = vpop.f32.mrf.mxu0 }
 0x358   :  { %v432_v50 = vadd.f32 %v376_v41, %v2829_v22  ;;  %v434_v51 = vadd.f32 %v423_v42, %v2829_v22 }
 0x359   :  { %v2335_v43 = vpop.f32.mrf.mxu1  ;;  %v2341_v44 = vpop.f32.mrf.mxu0 }
 0x35a   :  { %v451_v52 = vsel %vm435_vm13, %v432_v50, -inf  ;;  %v457_v53 = vsel %vm435_vm13, %v434_v51, -inf }
 0x35b   :  { %440 = vmax.xlane.f32.xlu1 %v439_v48 }
 0x35f   :  { %449 = vmax.xlane.f32.xlu1 %v448_v49 }
 0x36d   :  { %696 = vrot.lane.b32.xlu0 %v2799_v55, %s2621_s1 }
 0x370   :  { %536 = vrot.lane.b32.xlu1 %v2781_v47, %s2621_s1 }
 0x374   :  { %529 = vrot.lane.b32.xlu1 %v2778_v46, %s2621_s1 }
 0x398   :  { %452 = vmax.xlane.f32.xlu1 %v451_v52 }
 0x39c   :  { %458 = vmax.xlane.f32.xlu1 %v457_v53 }
 0x3ad   :  { %639 = vrot.lane.b32.xlu1 %v2796_v54, %s2621_s1 }
 0x3d8   :  { %v444_v56 = vpop.xlane.xlu1 %443 }
 0x3d9   :  { %v462_v5 = vsub.f32 %v429_v17, %v444_v56 }
 0x3db   :  { %v472_v6 = vmul.f32 1.442695, %v462_v5 }
 0x3dc   :  { %v438_v57 = vpop.xlane.xlu1 %437 }
 0x3dd   :  { %v460_v7 = vsub.f32 %v427_v20, %v438_v57 }
 0x3df   :  { %v468_v8 = vmul.f32 1.442695, %v460_v7 }
 0x3e0   :  { %v447_v58 = vpop.xlane.xlu1 %446  ;;  %v456_v12 = vpop.xlane.xlu0 %455 }
 0x3e1   :  { %v463_v59 = vsub.f32 %v430_v27, %v447_v58  ;;  %v466_v15 = vsub.f32 %v433_v33, %v456_v12 }
 0x3e3   :  { %v474_v60 = vmul.f32 1.442695, %v463_v59  ;;  %v480_v18 = vmul.f32 1.442695, %v466_v15 }
 0x3e4   :  { %v441_v61 = vpop.xlane.xlu1 %440  ;;  %v2896_v49 = vpop.permute.xlu0 %696 }
 0x3e5   :  { %2526 = vpow2.f32 %v474_v60  ;;  %v461_v9 = vsub.f32 %v428_v36, %v441_v61 }
 0x3e6   :  { %2528 = vpow2.f32 %v472_v6 }
 0x3e7   :  { %2530 = vpow2.f32 %v468_v8  ;;  %v470_v10 = vmul.f32 1.442695, %v461_v9 }
 0x3e8   :  { %v450_v62 = vpop.xlane.xlu1 %449 }
 0x3e9   :  { %v464_v11 = vsub.f32 %v431_v45, %v450_v62  ;;  %2532 = vpow2.f32 %v470_v10 }
 0x3eb   :  { %v476_v16 = vmul.f32 1.442695, %v464_v11 }
 0x3ec   :  { %v2852_v63 = vpop.permute.xlu1 %536 }
 0x3ed   :  { %v539_v0 = vmul.f32 %v2852_v63, %v2769_v38  ;;  %v540_v1 = vmul.f32 %v2852_v63, %v2771_v39  ;;  %2534 = vpow2.f32 %v476_v16 }
 0x3ee   :  { %2536 = vpow2.f32 %v480_v18 }
 0x3ef   :  { %v541_v2 = vpack.c.bf16 %v540_v1, %v539_v0 }
 0x3f0   :  { %v2874_v26 = vpop.permute.xlu1 %529 }
 0x3f1   :  { %543 = vrot.lane.b32.xlu1 %v541_v2, %s2621_s1  ;;  %v532_v56 = vmul.f32 %v2874_v26, %v2769_v38  ;;  %v533_v57 = vmul.f32 %v2874_v26, %v2771_v39 }
 0x3f2   :  { %v2859_v3 = vpop.eup %2526 }
 0x3f3   :  { %v493_v4 = vsel %vm435_vm13, %v2859_v3, 0.0  ;;  %v2529_v19 = vpop.eup %2528  ;;  %v534_v58 = vpack.c.bf16 %v533_v57, %v532_v56 }
 0x3f4   :  { %494 = vadd.xlane.f32.xlu0 %v493_v4  ;;  %v490_v21 = vsel %vm435_vm13, %v2529_v19, 0.0  ;;  %v2864_v23 = vpop.eup %2530 }
 0x3f5   :  { %v484_v17 = vsel %vm435_vm13, %v2864_v23, 0.0 }
 0x3f6   :  { %v2868_v20 = vpop.eup %2532 }
 0x3f7   :  { %v487_v24 = vsel %vm435_vm13, %v2868_v20, 0.0 }
 0x3fa   :  { %v2872_v25 = vpop.eup %2534 }
 0x3fb   :  { %v496_v27 = vsel %vm435_vm13, %v2872_v25, 0.0  ;;  %v2878_v28 = vpop.eup %2536 }
 0x3fc   :  { %v502_v34 = vsel %vm435_vm13, %v2878_v28, 0.0 }
 0x415   :  { %491 = vadd.xlane.f32.xlu1 %v490_v21 }
 0x419   :  { %485 = vadd.xlane.f32.xlu1 %v484_v17 }
 0x41d   :  { %488 = vadd.xlane.f32.xlu1 %v487_v24 }
 0x421   :  { %v453_v29 = vpop.xlane.xlu1 %452  ;;  %497 = vadd.xlane.f32.xlu1 %v496_v27 }
 0x422   :  { %v465_v30 = vsub.f32 %v432_v50, %v453_v29  ;;  %v699_v50 = vmul.f32 %v2896_v49, %v2769_v38 }
 0x424   :  { %v478_v33 = vmul.f32 1.442695, %v465_v30 }
 0x425   :  { %503 = vadd.xlane.f32.xlu1 %v502_v34  ;;  %v459_v35 = vpop.xlane.xlu1 %458 }
 0x426   :  { %2538 = vpow2.f32 %v478_v33  ;;  %v467_v36 = vsub.f32 %v434_v51, %v459_v35  ;;  %v700_v51 = vmul.f32 %v2896_v49, %v2771_v39 }
 0x428   :  { %v482_v37 = vmul.f32 1.442695, %v467_v36  ;;  %v701_v53 = vpack.c.bf16 %v700_v51, %v699_v50 }
 0x429   :  { %v2890_v44 = vpop.permute.xlu1 %639 }
 0x42a   :  { %2540 = vpow2.f32 %v482_v37  ;;  %v642_v45 = vmul.f32 %v2890_v44, %v2769_v38  ;;  %v643_v48 = vmul.f32 %v2890_v44, %v2771_v39 }
 0x42c   :  { %v644_v52 = vpack.c.bf16 %v643_v48, %v642_v45 }
 0x433   :  { %v2882_v40 = vpop.eup %2538 }
 0x434   :  { %v499_v41 = vsel %vm435_vm13, %v2882_v40, 0.0 }
 0x435   :  { %500 = vadd.xlane.f32.xlu1 %v499_v41 }
 0x437   :  { %v2886_v42 = vpop.eup %2540 }
 0x438   :  { %v505_v43 = vsel %vm435_vm13, %v2886_v42, 0.0 }
 0x439   :  { %506 = vadd.xlane.f32.xlu0 %v505_v43 }
 0x446   :  { %646 = vrot.lane.b32.xlu1 %v644_v52, %s2621_s1 }
 0x44a   :  { %703 = vrot.lane.b32.xlu1 %v701_v53, %s2621_s1 }
 0x44f   :  { %591 = vrot.lane.b32.xlu0 %v534_v58, %s2621_s1 }
 0x463   :  { %v544_v59 = vpop.permute.xlu1 %543 }
 0x464   :  { %2343 = vmatpush3.bf16.msra.mxu1 %v544_v59 }
 0x465   :  { %2354 = vmatprep.subr.bf16.mxu1 %v2618_v14 }
 0x47d   :  { %v495_v60 = vpop.xlane.xlu0 %494 }
 0x47e   :  { %2542 = vrcp.f32 %v495_v60 }
 0x48b   :  { %v2543_v0 = vpop.eup %2542 }
 0x48c   :  { %v519_v2 = vmul.f32 %v2543_v0, %v2859_v3 }
 0x49e   :  { %v492_v61 = vpop.xlane.xlu1 %491 }
 0x49f   :  { %2544 = vrcp.f32 %v492_v61 }
 0x4a2   :  { %v486_v62 = vpop.xlane.xlu1 %485 }
 0x4a6   :  { %v489_v39 = vpop.xlane.xlu1 %488 }
 0x4a7   :  { %2546 = vrcp.f32 %v489_v39 }
 0x4a8   :  { %2548 = vrcp.f32 %v486_v62 }
 0x4aa   :  { %v498_v5 = vpop.xlane.xlu1 %497 }
 0x4ab   :  { %2550 = vrcp.f32 %v498_v5 }
 0x4ac   :  { %v2545_v1 = vpop.eup %2544 }
 0x4ad   :  { %v518_v38 = vmul.f32 %v2545_v1, %v2529_v19 }
 0x4ae   :  { %v504_v6 = vpop.xlane.xlu1 %503 }
 0x4af   :  { %v525_v4 = vpack.c.bf16 %v519_v2, %v518_v38  ;;  %v2160_v38 = vld [vmem:[%s3243_s7] ss:$0 sm:$0xff] }
 0x4b1   :  { %2345 = vmatmul.mubr.msk.bf16.vlgmr.msra.gmra.mxu1 %vm435_vm13, %v525_v4 }
 0x4b2   :  { %2356 = vmatprep.mubr.msk.bf16.mxu1 %vm2619_vm1, %v2618_v14 }
 0x4b4   :  { %v2547_v8 = vpop.eup %2546 }
 0x4b5   :  { %v2549_v11 = vpop.eup %2548  ;;  %v517_v3 = vmul.f32 %v2547_v8, %v2868_v20 }
 0x4b6   :  { %v516_v15 = vmul.f32 %v2549_v11, %v2864_v23 }
 0x4b8   :  { %v524_v16 = vpack.c.bf16 %v517_v3, %v516_v15  ;;  %v2551_v18 = vpop.eup %2550 }
 0x4b9   :  { %v520_v17 = vmul.f32 %v2551_v18, %v2872_v25  ;;  %v2500_v25 = vld [vmem:[%s3242_s6 + $0x8] sm:$0xff]  }
 0x4be   :  { %v501_v7 = vpop.xlane.xlu1 %500 }
 0x4bf   :  { %2552 = vrcp.f32 %v501_v7 }
 0x4c0   :  { %2554 = vrcp.f32 %v504_v6 }
 0x4c2   :  { %v507_v9 = vpop.xlane.xlu0 %506  ;;  %v647_v10 = vpop.permute.xlu1 %646 }
 0x4c3   :  { %2556 = vrcp.f32 %v507_v9  ;;  %2355 = vmatpush3.bf16.msra.mxu1 %v647_v10 }
 0x4c4   :  { %2366 = vmatprep.subr.bf16.mxu1 %v2618_v14 }
 0x4c6   :  { %v592_v12 = vpop.permute.xlu0 %591  ;;  %v704_v19 = vpop.permute.xlu1 %703 }
 0x4c7   :  { %2349 = vmatpush3.bf16.msra.mxu0 %v592_v12 }
 0x4c8   :  { %2360 = vmatprep.subr.bf16.mxu0 %v2618_v14 }
 0x4ca   :  { %2351 = vmatmul.mubr.msk.bf16.vlgmr.msra.gmra.mxu0 %vm435_vm13, %v524_v16 }
 0x4cb   :  { %2361 = vmatpush3.bf16.msra.mxu0 %v704_v19  ;;  %2362 = vmatprep.mubr.msk.bf16.mxu0 %vm2619_vm1, %v2618_v14 }
 0x4cc   :  { %v2553_v21 = vpop.eup %2552  ;;  %2374 = vmatprep.subr.bf16.mxu0 %v2618_v14 }
 0x4cd   :  { %v521_v20 = vmul.f32 %v2553_v21, %v2882_v40  ;;  %v2555_v23 = vpop.eup %2554 }
 0x4ce   :  { %v522_v29 = vmul.f32 %v2555_v23, %v2878_v28  ;;  %v2501_v28 = vld [vmem:[%s3242_s6] sm:$0xff]  }
 0x4cf   :  { %v526_v24 = vpack.c.bf16 %v521_v20, %v520_v17  ;;  %v2503_v23 = vld [vmem:[%s3244_s10] sm:$0xff]  }
 0x4d0   :  { %v2557_v27 = vpop.eup %2556 }
 0x4d1   :  { %2357 = vmatmul.mubr.msk.bf16.vlgmr.msra.gmra.mxu1 %vm435_vm13, %v526_v24  ;;  %v523_v30 = vmul.f32 %v2557_v27, %v2886_v42 }
 0x4d2   :  { %2370 = vmatprep.mubr.msk.bf16.mxu1 %vm2619_vm1, %v2618_v14  ;;  %2367 = vmatpush3.bf16.msra.mxu1 %v2500_v25 }
 0x4d3   :  { %v527_v33 = vpack.c.bf16 %v523_v30, %v522_v29  ;;  %2368 = vmatprep.subr.bf16.mxu1 %v2618_v14 }
 0x4d5   :  { %2363 = vmatmul.mubr.msk.bf16.vlgmr.msra.gmra.mxu0 %vm435_vm13, %v527_v33 }
 0x4d6   :  { %2378 = vmatprep.mubr.msk.bf16.mxu0 %vm2619_vm1, %v2618_v14  ;;  %2369 = vmatpush3.bf16.msra.mxu1 %v2501_v28 }
 0x4d7   :  { %2382 = vmatprep.subr.bf16.mxu1 %v2618_v14 }
 0x571   :  { %v583_v34 = vpop.f32.mrf.mxu1 }
 0x573   :  { %v2346_v35 = vpop.f32.mrf.mxu1 }
 0x574   :  { %v2164_v35 = vld [vmem:[%s3245_s8] ss:$0 sm:$0xff] }
 0x575   :  { %v586_v36 = vpop.f32.mrf.mxu1 }
 0x577   :  { %v2347_v37 = vpop.f32.mrf.mxu1 }
 0x58a   :  { %v631_v40 = vpop.f32.mrf.mxu0 }
 0x58b   :  { %v632_v52 = vadd.f32 %v631_v40, %v583_v34 }
 0x58c   :  { %v2352_v41 = vpop.f32.mrf.mxu0 }
 0x58d   :  { %v2165_v41 = vld [vmem:[%s3246_s9] ss:$0 sm:$0xff] }
 0x58e   :  { %v634_v42 = vpop.f32.mrf.mxu0 }
 0x58f   :  { %v635_v53 = vadd.f32 %v634_v42, %v586_v36 }
 0x590   :  { %v2353_v43 = vpop.f32.mrf.mxu0 }
 0x591   :  { %v686_v45 = vpop.f32.mrf.mxu1 }
 0x592   :  { %v693_v58 = vadd.f32 %v686_v45, %v632_v52  ;;  %v2506_v52 = vld [vmem:[%s3247_s12 + $0x8] sm:$0xff]  }
 0x593   :  { %v2358_v48 = vpop.f32.mrf.mxu1 }
 0x595   :  { %v689_v50 = vpop.f32.mrf.mxu1  ;;  %v743_v51 = vpop.f32.mrf.mxu0 }
 0x596   :  { %v694_v59 = vadd.f32 %v689_v50, %v635_v53  ;;  %v750_v61 = vadd.f32 %v743_v51, %v693_v58  ;;  %v2504_v50 = vld [vmem:[%s3247_s12 + $0x18] sm:$0xff]   ;;  %v2505_v51 = vld [vmem:[%s3247_s12 + $0x10] sm:$0xff]   ;;  %v2507_v53 = vld [vmem:[%s3247_s12] sm:$0xff]  }
 0x597   :  { %v2359_v56 = vpop.f32.mrf.mxu1  ;;  %v2364_v57 = vpop.f32.mrf.mxu0 }
 0x598   :  { %v2166_v56 = vld [vmem:[%s3248_s11] ss:$0 sm:$0xff] }
 0x599   :  { %v746_v60 = vpop.f32.mrf.mxu0 }
 0x59a   :  { %v751_v62 = vadd.f32 %v746_v60, %v694_v59 }
 0x59b   :  { %v2365_v0 = vpop.f32.mrf.mxu0 }
 0x59c   :  { %v752_v1 = vpack.c.bf16 %v751_v62, %v750_v61 }
 0x59e   :  { %2371 = vmatmul.mubr.msk.bf16.vlgmr.msra.gmra.mxu1 %vm72_vm0, %v752_v1 }
 0x59f   :  { %2390 = vmatprep.mubr.msk.bf16.mxu1 %vm2619_vm1, %v2618_v14  ;;  %2383 = vmatpush3.bf16.msra.mxu1 %v2504_v50 }
 0x5a0   :  { %2384 = vmatprep.subr.bf16.mxu1 %v2618_v14 }
 0x5a3   :  { %2385 = vmatpush3.bf16.msra.mxu1 %v2505_v51 }
 0x5a4   :  { %2386 = vmatprep.subr.bf16.mxu1 %v2618_v14 }
 0x5a7   :  { %2387 = vmatpush3.bf16.msra.mxu1 %v2506_v52 }
 0x5a8   :  { %2388 = vmatprep.subr.bf16.mxu1 %v2618_v14 }
 0x5ab   :  { %2389 = vmatpush3.bf16.msra.mxu1 %v2507_v53 }
 0x5ac   :  { %2408 = vmatprep.subr.bf16.mxu1 %v2618_v14 }
 0x65e   :  { %v813_v2 = vpop.f32.mrf.mxu1 }
 0x65f   :  { %v814_v39 = vadd.f32 %v2160_v38, %v813_v2 }
 0x660   :  { %v2372_v4 = vpop.f32.mrf.mxu1 }
 0x661   :  { %v820_v5 = vadd.f32 %v814_v39, %v2757_v31 }
 0x662   :  { %v816_v6 = vpop.f32.mrf.mxu1 }
 0x663   :  { %v817_v7 = vadd.f32 %v2160_v38, %v816_v6  ;;  %v824_v8 = vsel %vm72_vm0, %v820_v5, 0.0 }
 0x664   :  { %825 = vadd.xlane.f32.xlu0 %v824_v8  ;;  %v2373_v9 = vpop.f32.mrf.mxu1 }
 0x665   :  { %v821_v10 = vadd.f32 %v817_v7, %v2759_v32  ;;  %v2502_v32 = vld [vmem:[%s3244_s10 + $0x8] sm:$0xff]  }
 0x666   :  { %2375 = vmatpush3.bf16.msra.mxu0 %v2502_v32 }
 0x667   :  { %v827_v11 = vsel %vm72_vm0, %v821_v10, 0.0  ;;  %2376 = vmatprep.subr.bf16.mxu0 %v2618_v14 }
 0x668   :  { %828 = vadd.xlane.f32.xlu1 %v827_v11 }
 0x66a   :  { %2377 = vmatpush3.bf16.msra.mxu0 %v2503_v23 }
 0x66b   :  { %2394 = vmatprep.subr.bf16.mxu0 %v2618_v14 }
 0x6ed   :  { %v826_v3 = vpop.xlane.xlu0 %825 }
 0x6ee   :  { %v830_v12 = vmul.f32 0.03125, %v826_v3 }
 0x6f0   :  { %v832_v15 = vsub.f32 %v820_v5, %v830_v12 }
 0x6f1   :  { %v829_v16 = vpop.xlane.xlu1 %828 }
 0x6f2   :  { %v831_v18 = vmul.f32 0.03125, %v829_v16  ;;  %v834_v19 = vmul.f32 %v832_v15, %v832_v15 }
 0x6f4   :  { %v833_v21 = vsub.f32 %v821_v10, %v831_v18  ;;  %v836_v31 = vsel %vm72_vm0, %v834_v19, 0.0 }
 0x6f5   :  { %837 = vadd.xlane.f32.xlu0 %v836_v31 }
 0x6f6   :  { %v835_v17 = vmul.f32 %v833_v21, %v833_v21 }
 0x6f8   :  { %v839_v20 = vsel %vm72_vm0, %v835_v17, 0.0 }
 0x6f9   :  { %840 = vadd.xlane.f32.xlu0 %v839_v20 }
 0x77e   :  { %v838_v24 = vpop.xlane.xlu0 %837 }
 0x77f   :  { %v842_v27 = vmul.f32 0.03125, %v838_v24 }
 0x781   :  { %v844_v29 = vadd.f32 1e-12, %v842_v27 }
 0x782   :  { %v841_v30 = vpop.xlane.xlu0 %840 }
 0x783   :  { %2558 = vrsqrt.f32 %v844_v29  ;;  %v843_v33 = vmul.f32 0.03125, %v841_v30 }
 0x785   :  { %v845_v25 = vadd.f32 1e-12, %v843_v33 }
 0x787   :  { %2560 = vrsqrt.f32 %v845_v25 }
 0x790   :  { %v2559_v28 = vpop.eup %2558 }
 0x791   :  { %v848_v34 = vmul.f32 %v2559_v28, %v832_v15 }
 0x793   :  { %v856_v40 = vmul.f32 %v2164_v35, %v848_v34 }
 0x794   :  { %v2561_v36 = vpop.eup %2560 }
 0x795   :  { %v849_v37 = vmul.f32 %v2561_v36, %v833_v21  ;;  %v864_v43 = vadd.f32 %v2165_v41, %v856_v40  ;;  %v2170_v21 = vld [vmem:[%s3249_s13] ss:$0 sm:$0xff] }
 0x797   :  { %v857_v42 = vmul.f32 %v2164_v35, %v849_v37 }
 0x799   :  { %v865_v45 = vadd.f32 %v2165_v41, %v857_v42 }
 0x79b   :  { %v866_v48 = vpack.c.bf16 %v865_v45, %v864_v43 }
 0x79d   :  { %2379 = vmatmul.mubr.msk.bf16.vlgmr.msra.gmra.mxu0 %vm72_vm0, %v866_v48  ;;  %v2509_v48 = vld [vmem:[%s3266_s26 + $0x10] sm:$0xff]  }
 0x79e   :  { %2398 = vmatprep.mubr.msk.bf16.mxu0 %vm2619_vm1, %v2618_v14 }
 0x85d   :  { %v927_v57 = vpop.f32.mrf.mxu0 }
 0x85e   :  { %v928_v58 = vadd.f32 %v2166_v56, %v927_v57 }
 0x85f   :  { %v2380_v59 = vpop.f32.mrf.mxu0 }
 0x860   :  { %v936_v60 = vmul.f32 0.044715, %v928_v58  ;;  %v934_v3 = vmul.f32 0.5, %v928_v58 }
 0x861   :  { %v930_v61 = vpop.f32.mrf.mxu0 }
 0x862   :  { %v938_v62 = vmul.f32 %v936_v60, %v928_v58  ;;  %v931_v0 = vadd.f32 %v2166_v56, %v930_v61  ;;  %v2176_v60 = vld [vmem:[%s3250_s14] ss:$0 sm:$0xff] }
 0x863   :  { %v2381_v1 = vpop.f32.mrf.mxu0 }
 0x864   :  { %v940_v38 = vmul.f32 %v938_v62, %v928_v58  ;;  %v937_v2 = vmul.f32 0.044715, %v931_v0  ;;  %v935_v12 = vmul.f32 0.5, %v931_v0  ;;  %v2177_v1 = vld [vmem:[%s3251_s15] ss:$0 sm:$0xff] }
 0x866   :  { %v942_v39 = vadd.f32 %v940_v38, %v928_v58  ;;  %v939_v4 = vmul.f32 %v937_v2, %v931_v0 }
 0x868   :  { %v944_v5 = vmul.f32 0.7978846, %v942_v39  ;;  %v941_v6 = vmul.f32 %v939_v4, %v931_v0 }
 0x86a   :  { %2562 = vtanh.f32 %v944_v5  ;;  %v943_v7 = vadd.f32 %v941_v6, %v931_v0  ;;  %v2183_v5 = vld [vmem:[%s3269_s24 + $0x1] ss:$0 sm:$0xff] }
 0x86c   :  { %v945_v8 = vmul.f32 0.7978846, %v943_v7 }
 0x86e   :  { %2564 = vtanh.f32 %v945_v8 }
 0x877   :  { %v2563_v9 = vpop.eup %2562 }
 0x878   :  { %v948_v10 = vadd.f32 1.0, %v2563_v9 }
 0x87a   :  { %v950_v16 = vmul.f32 %v948_v10, %v934_v3 }
 0x87b   :  { %v2565_v11 = vpop.eup %2564 }
 0x87c   :  { %v949_v15 = vadd.f32 1.0, %v2565_v11 }
 0x87e   :  { %v951_v18 = vmul.f32 %v949_v15, %v935_v12 }
 0x880   :  { %v952_v19 = vpack.c.bf16 %v951_v18, %v950_v16 }
 0x882   :  { %2391 = vmatmul.mubr.msk.bf16.vlgmr.msra.gmra.mxu1 %vm992_vm15, %v952_v19 }
 0x883   :  { %2410 = vmatprep.mubr.msk.bf16.mxu1 %vm2619_vm1, %v2618_v14 }
 0x942   :  { %v1030_v31 = vpop.f32.mrf.mxu1 }
 0x943   :  { %v1031_v17 = vadd.f32 %v2170_v21, %v1030_v31 }
 0x944   :  { %v2392_v20 = vpop.f32.mrf.mxu1 }
 0x945   :  { %v1037_v32 = vadd.f32 %v1031_v17, %v864_v43 }
 0x946   :  { %v1033_v23 = vpop.f32.mrf.mxu1 }
 0x947   :  { %v1034_v24 = vadd.f32 %v2170_v21, %v1033_v23  ;;  %v1041_v27 = vsel %vm72_vm0, %v1037_v32, 0.0 }
 0x948   :  { %1042 = vadd.xlane.f32.xlu1 %v1041_v27  ;;  %v2393_v29 = vpop.f32.mrf.mxu1 }
 0x949   :  { %v1038_v30 = vadd.f32 %v1034_v24, %v865_v45  ;;  %v2508_v45 = vld [vmem:[%s3266_s26 + $0x18] sm:$0xff]  }
 0x94a   :  { %2395 = vmatpush3.bf16.msra.mxu0 %v2508_v45 }
 0x94b   :  { %v1044_v33 = vsel %vm72_vm0, %v1038_v30, 0.0  ;;  %2396 = vmatprep.subr.bf16.mxu0 %v2618_v14 }
 0x94c   :  { %1045 = vadd.xlane.f32.xlu0 %v1044_v33 }
 0x94e   :  { %2397 = vmatpush3.bf16.msra.mxu0 %v2509_v48 }
 0x94f   :  { %2402 = vmatprep.subr.bf16.mxu0 %v2618_v14 }
 0x9d1   :  { %v1043_v25 = vpop.xlane.xlu1 %1042 }
 0x9d2   :  { %v1047_v28 = vmul.f32 0.03125, %v1043_v25 }
 0x9d4   :  { %v1049_v34 = vsub.f32 %v1037_v32, %v1047_v28 }
 0x9d5   :  { %v1046_v35 = vpop.xlane.xlu0 %1045 }
 0x9d6   :  { %v1048_v36 = vmul.f32 0.03125, %v1046_v35  ;;  %v1051_v37 = vmul.f32 %v1049_v34, %v1049_v34 }
 0x9d8   :  { %v1050_v40 = vsub.f32 %v1038_v30, %v1048_v36  ;;  %v1053_v41 = vsel %vm72_vm0, %v1051_v37, 0.0 }
 0x9d9   :  { %1054 = vadd.xlane.f32.xlu1 %v1053_v41 }
 0x9da   :  { %v1052_v42 = vmul.f32 %v1050_v40, %v1050_v40 }
 0x9dc   :  { %v1056_v43 = vsel %vm72_vm0, %v1052_v42, 0.0 }
 0x9dd   :  { %1057 = vadd.xlane.f32.xlu0 %v1056_v43 }
 0xa62   :  { %v1055_v50 = vpop.xlane.xlu1 %1054 }
 0xa63   :  { %v1059_v51 = vmul.f32 0.03125, %v1055_v50 }
 0xa65   :  { %v1061_v52 = vadd.f32 1e-12, %v1059_v51 }
 0xa66   :  { %v1058_v53 = vpop.xlane.xlu0 %1057 }
 0xa67   :  { %2566 = vrsqrt.f32 %v1061_v52  ;;  %v1060_v56 = vmul.f32 0.03125, %v1058_v53 }
 0xa69   :  { %v1062_v57 = vadd.f32 1e-12, %v1060_v56 }
 0xa6b   :  { %2568 = vrsqrt.f32 %v1062_v57 }
 0xa74   :  { %v2567_v58 = vpop.eup %2566 }
 0xa75   :  { %v1065_v59 = vmul.f32 %v2567_v58, %v1049_v34 }
 0xa77   :  { %v1073_v0 = vmul.f32 %v2176_v60, %v1065_v59 }
 0xa78   :  { %v2569_v61 = vpop.eup %2568 }
 0xa79   :  { %v1066_v62 = vmul.f32 %v2569_v61, %v1050_v40  ;;  %v3012_v2 = vadd.f32 %v2177_v1, %v1073_v0 }
 0xa7b   :  { %v1074_v38 = vmul.f32 %v2176_v60, %v1066_v62 }
 0xa7d   :  { %v3014_v39 = vadd.f32 %v2177_v1, %v1074_v38 }
 0xa7f   :  { %v1083_v4 = vpack.c.bf16 %v3014_v39, %v3012_v2 }
 0xa81   :  { %2399 = vmatmul.mubr.msk.bf16.vlgmr.msra.gmra.mxu0 %vm72_vm0, %v1083_v4 }
 0xa82   :  { %2404 = vmatprep.mubr.msk.bf16.mxu0 %vm2619_vm1, %v2618_v14 }
 0xb41   :  { %v1146_v6 = vpop.f32.mrf.mxu0 }
 0xb42   :  { %v1147_v7 = vadd.f32 %v2183_v5, %v1146_v6 }
 0xb43   :  { %v2400_v8 = vpop.f32.mrf.mxu0 }
 0xb44   :  { %v1154_v10 = vmul.f32 %v2778_v46, %v1147_v7  ;;  %v1207_v3 = vmul.f32 %v2781_v47, %v1147_v7  ;;  %v1254_v12 = vmul.f32 %v2796_v54, %v1147_v7  ;;  %v1301_v15 = vmul.f32 %v2799_v55, %v1147_v7 }
 0xb45   :  { %v1149_v9 = vpop.f32.mrf.mxu0  ;;  %v3029_v18 = vmul.f32 %v1147_v7, %v2874_v26  ;;  %v3032_v19 = vmul.f32 %v1147_v7, %v2890_v44  ;;  %v3035_v21 = vmul.f32 %v1147_v7, %v2896_v49  ;;  %v3038_v31 = vmul.f32 %v1147_v7, %v2852_v63 }
 0xb46   :  { %v1150_v11 = vadd.f32 %v2183_v5, %v1149_v9 }
 0xb47   :  { %v2401_v16 = vpop.f32.mrf.mxu0 }
 0xb48   :  { %v1153_v17 = vpack.c.bf16 %v1150_v11, %v1147_v7  ;;  %v1155_v20 = vmul.f32 %v2778_v46, %v1150_v11  ;;  %v1208_v32 = vmul.f32 %v2781_v47, %v1150_v11  ;;  %v1255_v23 = vmul.f32 %v2796_v54, %v1150_v11 }
 0xb49   :  { %v1302_v24 = vmul.f32 %v2799_v55, %v1150_v11  ;;  %v3045_v27 = vmul.f32 %v1150_v11, %v2874_v26  ;;  %v3048_v29 = vmul.f32 %v1150_v11, %v2890_v44  ;;  %v3051_v30 = vmul.f32 %v1150_v11, %v2896_v49 }
 0xb4a   :  { %1158 = vrot.lane.b32.xlu1 %v1153_v17, %s2620_s2  ;;  %v1156_v33 = vpack.c.bf16 %v1155_v20, %v1154_v10  ;;  %v1209_v25 = vpack.c.bf16 %v1208_v32, %v1207_v3  ;;  %v1256_v46 = vpack.c.bf16 %v1255_v23, %v1254_v12  ;;  %v3055_v47 = vmul.f32 %v1150_v11, %v2852_v63 }
 0xb4b   :  { %v1303_v54 = vpack.c.bf16 %v1302_v24, %v1301_v15  ;;  %v1450_v55 = vpack.c.bf16 %v3045_v27, %v3029_v18  ;;  %v1552_v26 = vpack.c.bf16 %v3048_v29, %v3032_v19  ;;  %v1605_v44 = vpack.c.bf16 %v3051_v30, %v3035_v21 }
 0xb4c   :  { %v1453_v49 = vpack.c.bf16 %v3055_v47, %v3038_v31 }
 0xbbc   :  { %v1159_v28 = vpop.permute.xlu1 %1158 }
 0xbbd   :  { %v1164_v34 = vsel %vm72_vm0, %v1159_v28, 0 }
 0xbbe   :  { %2403 = vmatpush3.bf16.xpose.msra.mxu0 %v1164_v34  ;;  %2409 = vmatpush3.bf16.xpose.msra.mxu1 %v1164_v34 }
 0xbbf   :  { %2414 = vmatprep.subr.bf16.mxu0 %v2618_v14  ;;  %2420 = vmatprep.subr.bf16.mxu1 %v2618_v14 }
 0xbc5   :  { %2405 = vmatmul.mubr.msk.bf16.vlgmr.msra.gmra.mxu0 %vm72_vm0, %v1156_v33  ;;  %2411 = vmatmul.mubr.msk.bf16.vlgmr.msra.gmra.mxu1 %vm72_vm0, %v1209_v25 }
 0xbc6   :  { %2415 = vmatpush3.bf16.xpose.msra.mxu0 %v1164_v34  ;;  %2421 = vmatpush3.bf16.xpose.msra.mxu1 %v1164_v34 }
 0xbc7   :  { %2416 = vmatprep.mubr.msk.bf16.mxu0 %vm2619_vm1, %v2618_v14  ;;  %2422 = vmatprep.mubr.msk.bf16.mxu1 %vm2619_vm1, %v2618_v14 }
 0xbc8   :  { %2432 = vmatprep.subr.bf16.mxu1 %v2618_v14  ;;  %2426 = vmatprep.subr.bf16.mxu0 %v2618_v14 }
 0xbcd   :  { %2417 = vmatmul.mubr.msk.bf16.vlgmr.msra.gmra.mxu0 %vm72_vm0, %v1256_v46  ;;  %2423 = vmatmul.mubr.msk.bf16.vlgmr.msra.gmra.mxu1 %vm72_vm0, %v1303_v54 }
 0xbce   :  { %2434 = vmatprep.mubr.msk.bf16.mxu1 %vm2619_vm1, %v2618_v14  ;;  %2428 = vmatprep.mubr.msk.bf16.mxu0 %vm2619_vm1, %v2618_v14 }
 0xc85   :  { %v1200_v63 = vpop.f32.mrf.mxu0  ;;  %v1247_v35 = vpop.f32.mrf.mxu1 }
 0xc86   :  { %v1350_v36 = vadd.f32 %v1247_v35, %v2824_v13  ;;  %v1348_v41 = vadd.f32 %v1200_v63, %v2824_v13 }
 0xc87   :  { %v2406_v37 = vpop.f32.mrf.mxu0  ;;  %v2412_v40 = vpop.f32.mrf.mxu1 }
 0xc88   :  { %v1362_v42 = vsel %vm435_vm13, %v1350_v36, -inf  ;;  %v1356_v52 = vsel %vm435_vm13, %v1348_v41, -inf }
 0xc89   :  { %1363 = vmax.xlane.f32.xlu0 %v1362_v42  ;;  %v1203_v43 = vpop.f32.mrf.mxu0  ;;  %v1250_v45 = vpop.f32.mrf.mxu1 }
 0xc8a   :  { %v1351_v51 = vadd.f32 %v1250_v45, %v2829_v22  ;;  %v1349_v59 = vadd.f32 %v1203_v43, %v2829_v22 }
 0xc8b   :  { %v2407_v48 = vpop.f32.mrf.mxu0  ;;  %v2413_v50 = vpop.f32.mrf.mxu1 }
 0xc8c   :  { %v1365_v60 = vsel %vm435_vm13, %v1351_v51, -inf  ;;  %v1359_v5 = vsel %vm435_vm13, %v1349_v59, -inf }
 0xc8d   :  { %v1341_v53 = vpop.f32.mrf.mxu1  ;;  %1357 = vmax.xlane.f32.xlu0 %v1356_v52  ;;  %v1294_v56 = vpop.f32.mrf.mxu0 }
 0xc8e   :  { %v1352_v4 = vadd.f32 %v1294_v56, %v2824_v13  ;;  %v1354_v7 = vadd.f32 %v1341_v53, %v2824_v13 }
 0xc8f   :  { %v2418_v57 = vpop.f32.mrf.mxu0  ;;  %v2424_v58 = vpop.f32.mrf.mxu1 }
 0xc90   :  { %v1368_v8 = vsel %vm435_vm13, %v1352_v4, -inf  ;;  %v1374_v10 = vsel %vm435_vm13, %v1354_v7, -inf }
 0xc91   :  { %v1344_v61 = vpop.f32.mrf.mxu1  ;;  %1366 = vmax.xlane.f32.xlu0 %v1365_v60  ;;  %v1297_v62 = vpop.f32.mrf.mxu0 }
 0xc92   :  { %v1353_v0 = vadd.f32 %v1297_v62, %v2829_v22  ;;  %v1355_v9 = vadd.f32 %v1344_v61, %v2829_v22 }
 0xc93   :  { %v2419_v1 = vpop.f32.mrf.mxu0  ;;  %v2425_v38 = vpop.f32.mrf.mxu1 }
 0xc94   :  { %v1371_v6 = vsel %vm435_vm13, %v1353_v0, -inf  ;;  %v1377_v11 = vsel %vm435_vm13, %v1355_v9, -inf }
 0xc95   :  { %1360 = vmax.xlane.f32.xlu0 %v1359_v5  ;;  %1372 = vmax.xlane.f32.xlu1 %v1371_v6 }
 0xc99   :  { %1369 = vmax.xlane.f32.xlu0 %v1368_v8 }
 0xc9d   :  { %1375 = vmax.xlane.f32.xlu0 %v1374_v10 }
 0xca1   :  { %1378 = vmax.xlane.f32.xlu0 %v1377_v11 }
 0xca6   :  { %1503 = vrot.lane.b32.xlu1 %v1450_v55, %s2621_s1 }
 0xcaa   :  { %1554 = vrot.lane.b32.xlu1 %v1552_v26, %s2621_s1 }
 0xd12   :  { %v1364_v3 = vpop.xlane.xlu0 %1363 }
 0xd13   :  { %v1382_v12 = vsub.f32 %v1350_v36, %v1364_v3 }
 0xd15   :  { %v1392_v15 = vmul.f32 1.442695, %v1382_v12 }
 0xd16   :  { %v1358_v16 = vpop.xlane.xlu0 %1357 }
 0xd17   :  { %2570 = vpow2.f32 %v1392_v15  ;;  %v1380_v13 = vsub.f32 %v1348_v41, %v1358_v16 }
 0xd19   :  { %v1388_v18 = vmul.f32 1.442695, %v1380_v13 }
 0xd1a   :  { %v1367_v19 = vpop.xlane.xlu0 %1366 }
 0xd1b   :  { %2572 = vpow2.f32 %v1388_v18  ;;  %v1383_v22 = vsub.f32 %v1351_v51, %v1367_v19 }
 0xd1d   :  { %v1394_v17 = vmul.f32 1.442695, %v1383_v22 }
 0xd1e   :  { %v1361_v20 = vpop.xlane.xlu0 %1360  ;;  %v1373_v32 = vpop.xlane.xlu1 %1372 }
 0xd1f   :  { %2574 = vpow2.f32 %v1394_v17  ;;  %v1381_v23 = vsub.f32 %v1349_v59, %v1361_v20  ;;  %v1385_v46 = vsub.f32 %v1353_v0, %v1373_v32 }
 0xd21   :  { %v1390_v24 = vmul.f32 1.442695, %v1381_v23  ;;  %v1398_v63 = vmul.f32 1.442695, %v1385_v46  ;;  %v2510_v23 = vld [vmem:[%s3242_s6 + $0x18] sm:$0xff]  }
 0xd22   :  { %v1370_v27 = vpop.xlane.xlu0 %1369  ;;  %v1504_v29 = vpop.permute.xlu1 %1503 }
 0xd23   :  { %2576 = vpow2.f32 %v1390_v24  ;;  %v1384_v33 = vsub.f32 %v1352_v4, %v1370_v27  ;;  %2433 = vmatpush3.bf16.msra.mxu1 %v1504_v29  ;;  %v2511_v24 = vld [vmem:[%s3242_s6 + $0x10] sm:$0xff]  }
 0xd24   :  { %v3100_v25 = vpop.eup %2570  ;;  %2444 = vmatprep.subr.bf16.mxu1 %v2618_v14 }
 0xd25   :  { %v1396_v54 = vmul.f32 1.442695, %v1384_v33  ;;  %v1410_v55 = vsel %vm435_vm13, %v3100_v25, 0.0 }
 0xd26   :  { %1411 = vadd.xlane.f32.xlu0 %v1410_v55  ;;  %v1376_v26 = vpop.xlane.xlu0 %1375  ;;  %v1555_v38 = vpop.permute.xlu1 %1554 }
 0xd27   :  { %2578 = vpow2.f32 %v1396_v54  ;;  %v1386_v28 = vsub.f32 %v1354_v7, %v1376_v26 }
 0xd28   :  { %v2573_v34 = vpop.eup %2572 }
 0xd29   :  { %v1400_v35 = vmul.f32 1.442695, %v1386_v28  ;;  %v1404_v36 = vsel %vm435_vm13, %v2573_v34, 0.0 }
 0xd2a   :  { %1405 = vadd.xlane.f32.xlu0 %v1404_v36  ;;  %v1379_v37 = vpop.xlane.xlu0 %1378 }
 0xd2b   :  { %2580 = vpow2.f32 %v1400_v35  ;;  %v1387_v40 = vsub.f32 %v1355_v9, %v1379_v37 }
 0xd2c   :  { %v2575_v41 = vpop.eup %2574  ;;  %2582 = vpow2.f32 %v1398_v63 }
 0xd2d   :  { %v1402_v42 = vmul.f32 1.442695, %v1387_v40  ;;  %v1413_v43 = vsel %vm435_vm13, %v2575_v41, 0.0 }
 0xd2e   :  { %1414 = vadd.xlane.f32.xlu0 %v1413_v43 }
 0xd2f   :  { %2584 = vpow2.f32 %v1402_v42 }
 0xd30   :  { %v2577_v45 = vpop.eup %2576 }
 0xd31   :  { %v1407_v48 = vsel %vm435_vm13, %v2577_v45, 0.0 }
 0xd32   :  { %1408 = vadd.xlane.f32.xlu0 %v1407_v48 }
 0xd34   :  { %v2579_v50 = vpop.eup %2578 }
 0xd35   :  { %v1416_v51 = vsel %vm435_vm13, %v2579_v50, 0.0 }
 0xd36   :  { %1417 = vadd.xlane.f32.xlu0 %v1416_v51 }
 0xd38   :  { %v2581_v52 = vpop.eup %2580 }
 0xd39   :  { %v1422_v53 = vsel %vm435_vm13, %v2581_v52, 0.0  ;;  %v2583_v56 = vpop.eup %2582 }
 0xd3a   :  { %1423 = vadd.xlane.f32.xlu0 %v1422_v53  ;;  %v1419_v59 = vsel %vm435_vm13, %v2583_v56, 0.0  ;;  %v2200_v53 = vld [vmem:[%s3243_s7 + $0x1] ss:$0 sm:$0xff] }
 0xd3c   :  { %v2585_v57 = vpop.eup %2584 }
 0xd3d   :  { %v1425_v58 = vsel %vm435_vm13, %v2585_v57, 0.0 }
 0xd3e   :  { %1426 = vadd.xlane.f32.xlu1 %v1425_v58  ;;  %1420 = vadd.xlane.f32.xlu0 %v1419_v59 }
 0xd4f   :  { %1607 = vrot.lane.b32.xlu1 %v1605_v44, %s2621_s1 }
 0xd54   :  { %1455 = vrot.lane.b32.xlu0 %v1453_v49, %s2621_s1 }
 0xdaf   :  { %v1412_v60 = vpop.xlane.xlu0 %1411 }
 0xdb3   :  { %v1406_v61 = vpop.xlane.xlu0 %1405 }
 0xdb7   :  { %v1415_v62 = vpop.xlane.xlu0 %1414 }
 0xdb8   :  { %2586 = vrcp.f32 %v1415_v62 }
 0xdb9   :  { %2588 = vrcp.f32 %v1406_v61 }
 0xdba   :  { %2590 = vrcp.f32 %v1412_v60 }
 0xdbb   :  { %v1409_v0 = vpop.xlane.xlu0 %1408 }
 0xdbc   :  { %2592 = vrcp.f32 %v1409_v0 }
 0xdbf   :  { %v1418_v1 = vpop.xlane.xlu0 %1417 }
 0xdc0   :  { %2594 = vrcp.f32 %v1418_v1 }
 0xdc3   :  { %v1424_v4 = vpop.xlane.xlu0 %1423 }
 0xdc4   :  { %2596 = vrcp.f32 %v1424_v4 }
 0xdc5   :  { %v2587_v5 = vpop.eup %2586 }
 0xdc6   :  { %v2589_v21 = vpop.eup %2588  ;;  %v1439_v47 = vmul.f32 %v2587_v5, %v2575_v41 }
 0xdc7   :  { %v1421_v30 = vpop.xlane.xlu0 %1420  ;;  %v1427_v44 = vpop.xlane.xlu1 %1426  ;;  %v1436_v49 = vmul.f32 %v2589_v21, %v2573_v34 }
 0xdc8   :  { %v2591_v6 = vpop.eup %2590  ;;  %2598 = vrcp.f32 %v1421_v30 }
 0xdc9   :  { %v2593_v31 = vpop.eup %2592  ;;  %2600 = vrcp.f32 %v1427_v44  ;;  %v1438_v9 = vmul.f32 %v2591_v6, %v3100_v25 }
 0xdca   :  { %v1437_v7 = vmul.f32 %v2593_v31, %v2577_v45 }
 0xdcb   :  { %v1456_v8 = vpop.permute.xlu0 %1455  ;;  %v1445_v11 = vpack.c.bf16 %v1439_v47, %v1438_v9  ;;  %v1608_v3 = vpop.permute.xlu1 %1607 }
 0xdcc   :  { %2427 = vmatpush3.bf16.msra.mxu0 %v1456_v8  ;;  %v1444_v10 = vpack.c.bf16 %v1437_v7, %v1436_v49  ;;  %v2513_v7 = vld [vmem:[%s3244_s10 + $0x10] sm:$0xff]  }
 0xdcd   :  { %2438 = vmatprep.subr.bf16.mxu0 %v2618_v14  ;;  %v2595_v12 = vpop.eup %2594 }
 0xdce   :  { %2435 = vmatmul.mubr.msk.bf16.vlgmr.msra.gmra.mxu1 %vm435_vm13, %v1444_v10  ;;  %v1440_v18 = vmul.f32 %v2595_v12, %v2579_v50 }
 0xdcf   :  { %2445 = vmatpush3.bf16.msra.mxu1 %v1608_v3  ;;  %2429 = vmatmul.mubr.msk.bf16.vlgmr.msra.gmra.mxu0 %vm435_vm13, %v1445_v11 }
 0xdd0   :  { %2439 = vmatpush3.bf16.msra.mxu0 %v1555_v38  ;;  %2440 = vmatprep.mubr.msk.bf16.mxu0 %vm2619_vm1, %v2618_v14 }
 0xdd1   :  { %2446 = vmatprep.mubr.msk.bf16.mxu1 %vm2619_vm1, %v2618_v14  ;;  %2450 = vmatprep.subr.bf16.mxu0 %v2618_v14  ;;  %v2597_v15 = vpop.eup %2596 }
 0xdd2   :  { %2458 = vmatprep.subr.bf16.mxu1 %v2618_v14  ;;  %v1442_v22 = vmul.f32 %v2597_v15, %v2581_v52 }
 0xdd5   :  { %v2599_v16 = vpop.eup %2598 }
 0xdd6   :  { %v2601_v13 = vpop.eup %2600  ;;  %v1441_v19 = vmul.f32 %v2599_v16, %v2583_v56 }
 0xdd7   :  { %v1443_v17 = vmul.f32 %v2601_v13, %v2585_v57  ;;  %v2206_v13 = vld [vmem:[%s3245_s8 + $0x1] ss:$0 sm:$0xff] }
 0xdd8   :  { %v1446_v20 = vpack.c.bf16 %v1441_v19, %v1440_v18 }
 0xdd9   :  { %v1447_v32 = vpack.c.bf16 %v1443_v17, %v1442_v22  ;;  %v2207_v17 = vld [vmem:[%s3246_s9 + $0x1] ss:$0 sm:$0xff] }
 0xdda   :  { %2441 = vmatmul.mubr.msk.bf16.vlgmr.msra.gmra.mxu0 %vm435_vm13, %v1446_v20 }
 0xddb   :  { %2447 = vmatmul.mubr.msk.bf16.vlgmr.msra.gmra.mxu1 %vm435_vm13, %v1447_v32  ;;  %2454 = vmatprep.mubr.msk.bf16.mxu0 %vm2619_vm1, %v2618_v14 }
 0xddc   :  { %2462 = vmatprep.mubr.msk.bf16.mxu1 %vm2619_vm1, %v2618_v14  ;;  %2451 = vmatpush3.bf16.msra.mxu0 %v2510_v23 }
 0xddd   :  { %2452 = vmatprep.subr.bf16.mxu0 %v2618_v14 }
 0xde0   :  { %2453 = vmatpush3.bf16.msra.mxu0 %v2511_v24 }
 0xde1   :  { %2466 = vmatprep.subr.bf16.mxu0 %v2618_v14 }
 0xe8e   :  { %v1543_v27 = vpop.f32.mrf.mxu1 }
 0xe8f   :  { %v1495_v29 = vpop.f32.mrf.mxu0 }
 0xe90   :  { %v2436_v33 = vpop.f32.mrf.mxu1  ;;  %v1544_v34 = vadd.f32 %v1543_v27, %v1495_v29  ;;  %v2514_v27 = vld [vmem:[%s3247_s12 + $0x38] sm:$0xff]   ;;  %v2515_v29 = vld [vmem:[%s3247_s12 + $0x30] sm:$0xff]  }
 0xe91   :  { %v2430_v25 = vpop.f32.mrf.mxu0  ;;  %v2516_v33 = vld [vmem:[%s3247_s12 + $0x28] sm:$0xff]  }
 0xe92   :  { %v1546_v46 = vpop.f32.mrf.mxu1  ;;  %v2517_v25 = vld [vmem:[%s3247_s12 + $0x20] sm:$0xff]  }
 0xe93   :  { %v1498_v54 = vpop.f32.mrf.mxu0 }
 0xe94   :  { %v2437_v55 = vpop.f32.mrf.mxu1  ;;  %v1547_v36 = vadd.f32 %v1546_v46, %v1498_v54  ;;  %v2213_v46 = vld [vmem:[%s3248_s11 + $0x1] ss:$0 sm:$0xff] }
 0xe95   :  { %v2431_v26 = vpop.f32.mrf.mxu0 }
 0xe9a   :  { %v1594_v28 = vpop.f32.mrf.mxu0 }
 0xe9b   :  { %v1647_v63 = vpop.f32.mrf.mxu1  ;;  %v1601_v37 = vadd.f32 %v1594_v28, %v1544_v34 }
 0xe9c   :  { %v2442_v35 = vpop.f32.mrf.mxu0 }
 0xe9d   :  { %v2448_v40 = vpop.f32.mrf.mxu1  ;;  %v1654_v48 = vadd.f32 %v1647_v63, %v1601_v37 }
 0xe9e   :  { %v1597_v41 = vpop.f32.mrf.mxu0 }
 0xe9f   :  { %v1602_v42 = vadd.f32 %v1597_v41, %v1547_v36  ;;  %v1650_v43 = vpop.f32.mrf.mxu1 }
 0xea0   :  { %v2443_v45 = vpop.f32.mrf.mxu0 }
 0xea1   :  { %v1655_v50 = vadd.f32 %v1650_v43, %v1602_v42  ;;  %v2449_v51 = vpop.f32.mrf.mxu1 }
 0xea3   :  { %v1656_v52 = vpack.c.bf16 %v1655_v50, %v1654_v48 }
 0xea5   :  { %2455 = vmatmul.mubr.msk.bf16.vlgmr.msra.gmra.mxu0 %vm72_vm0, %v1656_v52 }
 0xea6   :  { %2474 = vmatprep.mubr.msk.bf16.mxu0 %vm2619_vm1, %v2618_v14  ;;  %2467 = vmatpush3.bf16.msra.mxu0 %v2514_v27 }
 0xea7   :  { %2468 = vmatprep.subr.bf16.mxu0 %v2618_v14 }
 0xeaa   :  { %2469 = vmatpush3.bf16.msra.mxu0 %v2515_v29 }
 0xeab   :  { %2470 = vmatprep.subr.bf16.mxu0 %v2618_v14 }
 0xeae   :  { %2471 = vmatpush3.bf16.msra.mxu0 %v2516_v33  ;;  %v2235_v33 = vld [vmem:[%s3251_s15 + $0x1] ss:$0 sm:$0xff] }
 0xeaf   :  { %2472 = vmatprep.subr.bf16.mxu0 %v2618_v14 }
 0xeb2   :  { %2473 = vmatpush3.bf16.msra.mxu0 %v2517_v25 }
 0xf65   :  { %v1719_v56 = vpop.f32.mrf.mxu0 }
 0xf66   :  { %v1720_v57 = vadd.f32 %v2200_v53, %v1719_v56 }
 0xf67   :  { %v2456_v58 = vpop.f32.mrf.mxu0 }
 0xf68   :  { %v1726_v59 = vadd.f32 %v1720_v57, %v3012_v2 }
 0xf69   :  { %v1722_v60 = vpop.f32.mrf.mxu0 }
 0xf6a   :  { %v1723_v61 = vadd.f32 %v2200_v53, %v1722_v60  ;;  %v1732_v62 = vsel %vm72_vm0, %v1726_v59, 0.0 }
 0xf6b   :  { %1733 = vadd.xlane.f32.xlu0 %v1732_v62  ;;  %v2457_v0 = vpop.f32.mrf.mxu0  ;;  %v2226_v62 = vld [vmem:[%s3249_s13 + $0x1] ss:$0 sm:$0xff] }
 0xf6c   :  { %v1727_v1 = vadd.f32 %v1723_v61, %v3014_v39  ;;  %v2512_v39 = vld [vmem:[%s3244_s10 + $0x18] sm:$0xff]  }
 0xf6d   :  { %2459 = vmatpush3.bf16.msra.mxu1 %v2512_v39 }
 0xf6e   :  { %v1735_v38 = vsel %vm72_vm0, %v1727_v1, 0.0  ;;  %2460 = vmatprep.subr.bf16.mxu1 %v2618_v14 }
 0xf6f   :  { %1736 = vadd.xlane.f32.xlu1 %v1735_v38 }
 0xf71   :  { %2461 = vmatpush3.bf16.msra.mxu1 %v2513_v7 }
 0xf72   :  { %2478 = vmatprep.subr.bf16.mxu1 %v2618_v14 }
 0xff4   :  { %v1734_v4 = vpop.xlane.xlu0 %1733 }
 0xff5   :  { %v1738_v5 = vmul.f32 0.03125, %v1734_v4 }
 0xff7   :  { %v1740_v21 = vsub.f32 %v1726_v59, %v1738_v5 }
 0xff8   :  { %v1737_v30 = vpop.xlane.xlu1 %1736 }
 0xff9   :  { %v1739_v44 = vmul.f32 0.03125, %v1737_v30  ;;  %v1742_v6 = vmul.f32 %v1740_v21, %v1740_v21 }
 0xffb   :  { %v1741_v31 = vsub.f32 %v1727_v1, %v1739_v44  ;;  %v1744_v2 = vsel %vm72_vm0, %v1742_v6, 0.0 }
 0xffc   :  { %1745 = vadd.xlane.f32.xlu0 %v1744_v2 }
 0xffd   :  { %v1743_v47 = vmul.f32 %v1741_v31, %v1741_v31 }
 0xfff   :  { %v1747_v49 = vsel %vm72_vm0, %v1743_v47, 0.0 }
0x1000   :  { %1748 = vadd.xlane.f32.xlu0 %v1747_v49 }
0x1085   :  { %v1746_v8 = vpop.xlane.xlu0 %1745 }
0x1086   :  { %v1750_v9 = vmul.f32 0.03125, %v1746_v8 }
0x1088   :  { %v1752_v10 = vadd.f32 1e-12, %v1750_v9 }
0x1089   :  { %v1749_v11 = vpop.xlane.xlu0 %1748 }
0x108a   :  { %2602 = vrsqrt.f32 %v1752_v10  ;;  %v1751_v3 = vmul.f32 0.03125, %v1749_v11 }
0x108c   :  { %v1753_v12 = vadd.f32 1e-12, %v1751_v3 }
0x108e   :  { %2604 = vrsqrt.f32 %v1753_v12  ;;  %v2518_v12 = vld [vmem:[%s3252_s16 + $0x8] sm:$0xff]  }
0x1097   :  { %v2603_v15 = vpop.eup %2602 }
0x1098   :  { %v1756_v16 = vmul.f32 %v2603_v15, %v1740_v21  ;;  %v2519_v15 = vld [vmem:[%s3252_s16] sm:$0xff]  }
0x109a   :  { %v1764_v22 = vmul.f32 %v2206_v13, %v1756_v16 }
0x109b   :  { %v2605_v18 = vpop.eup %2604 }
0x109c   :  { %v1757_v19 = vmul.f32 %v2605_v18, %v1741_v31  ;;  %v1772_v32 = vadd.f32 %v2207_v17, %v1764_v22 }
0x109e   :  { %v1765_v20 = vmul.f32 %v2206_v13, %v1757_v19 }
0x10a0   :  { %v1773_v23 = vadd.f32 %v2207_v17, %v1765_v20 }
0x10a2   :  { %v1774_v24 = vpack.c.bf16 %v1773_v23, %v1772_v32 }
0x10a4   :  { %2463 = vmatmul.mubr.msk.bf16.vlgmr.msra.gmra.mxu1 %vm72_vm0, %v1774_v24 }
0x10a5   :  { %2482 = vmatprep.mubr.msk.bf16.mxu1 %vm2619_vm1, %v2618_v14  ;;  %2479 = vmatpush3.bf16.msra.mxu1 %v2518_v12 }
0x10a6   :  { %2480 = vmatprep.subr.bf16.mxu1 %v2618_v14 }
0x10a9   :  { %2481 = vmatpush3.bf16.msra.mxu1 %v2519_v15 }
0x10aa   :  { %2486 = vmatprep.subr.bf16.mxu1 %v2618_v14 }
0x1164   :  { %v1837_v54 = vpop.f32.mrf.mxu1 }
0x1165   :  { %v1838_v55 = vadd.f32 %v2213_v46, %v1837_v54 }
0x1166   :  { %v2464_v26 = vpop.f32.mrf.mxu1 }
0x1167   :  { %v1846_v28 = vmul.f32 0.044715, %v1838_v55  ;;  %v1844_v56 = vmul.f32 0.5, %v1838_v55  ;;  %v2520_v26 = vld [vmem:[%s3253_s18 + $0x8] sm:$0xff]  }
0x1168   :  { %v1840_v34 = vpop.f32.mrf.mxu1 }
0x1169   :  { %v1848_v63 = vmul.f32 %v1846_v28, %v1838_v55  ;;  %v1841_v35 = vadd.f32 %v2213_v46, %v1840_v34  ;;  %v2521_v28 = vld [vmem:[%s3253_s18] sm:$0xff]   ;;  %v25_v34 = vstv %s3254_s19 }
0x116a   :  { %v2465_v36 = vpop.f32.mrf.mxu1  ;;  %26 = vst [vmem:[#allocation2] sm:$0x1] %v25_v34 }
0x116b   :  { %v1850_v37 = vmul.f32 %v1848_v63, %v1838_v55  ;;  %v1847_v40 = vmul.f32 0.044715, %v1841_v35  ;;  %v1845_v57 = vmul.f32 0.5, %v1841_v35  ;;  %v2236_v63 = vld [vmem:[%s3255_s17] ss:$0 sm:$0xff] }
0x116d   :  { %v1852_v41 = vadd.f32 %v1850_v37, %v1838_v55  ;;  %v1849_v42 = vmul.f32 %v1847_v40, %v1841_v35 }
0x116f   :  { %v1854_v43 = vmul.f32 0.7978846, %v1852_v41  ;;  %v1851_v45 = vmul.f32 %v1849_v42, %v1841_v35 }
0x1171   :  { %2606 = vtanh.f32 %v1854_v43  ;;  %v1853_v48 = vadd.f32 %v1851_v45, %v1841_v35 }
0x1173   :  { %v1855_v50 = vmul.f32 0.7978846, %v1853_v48  ;;  %v2240_v48 = vld [vmem:[#allocation2] ss:$0 sm:$0xff] }
0x1175   :  { %2608 = vtanh.f32 %v1855_v50 }
0x117e   :  { %v2607_v51 = vpop.eup %2606 }
0x117f   :  { %v1858_v52 = vadd.f32 1.0, %v2607_v51 }
0x1181   :  { %v1860_v59 = vmul.f32 %v1858_v52, %v1844_v56 }
0x1182   :  { %v2609_v53 = vpop.eup %2608 }
0x1183   :  { %v1859_v58 = vadd.f32 1.0, %v2609_v53 }
0x1185   :  { %v1861_v60 = vmul.f32 %v1859_v58, %v1845_v57 }
0x1187   :  { %v1862_v61 = vpack.c.bf16 %v1861_v60, %v1860_v59 }
0x1189   :  { %2475 = vmatmul.mubr.msk.bf16.vlgmr.msra.gmra.mxu0 %vm992_vm15, %v1862_v61 }
0x1249   :  { %v1941_v0 = vpop.f32.mrf.mxu0 }
0x124a   :  { %v1942_v1 = vadd.f32 %v2226_v62, %v1941_v0 }
0x124b   :  { %v2476_v38 = vpop.f32.mrf.mxu0 }
0x124c   :  { %v1948_v4 = vadd.f32 %v1942_v1, %v1772_v32 }
0x124d   :  { %v1944_v5 = vpop.f32.mrf.mxu0 }
0x124e   :  { %v1945_v21 = vadd.f32 %v2226_v62, %v1944_v5  ;;  %v1954_v30 = vsel %vm72_vm0, %v1948_v4, 0.0 }
0x124f   :  { %1955 = vadd.xlane.f32.xlu0 %v1954_v30  ;;  %v2477_v44 = vpop.f32.mrf.mxu0 }
0x1250   :  { %v1949_v6 = vadd.f32 %v1945_v21, %v1773_v23  ;;  %v2234_v23 = vld [vmem:[%s3250_s14 + $0x1] ss:$0 sm:$0xff] }
0x1252   :  { %v1957_v31 = vsel %vm72_vm0, %v1949_v6, 0.0 }
0x1253   :  { %1958 = vadd.xlane.f32.xlu1 %v1957_v31 }
0x12d8   :  { %v1956_v2 = vpop.xlane.xlu0 %1955 }
0x12d9   :  { %v1960_v47 = vmul.f32 0.03125, %v1956_v2 }
0x12db   :  { %v1962_v49 = vsub.f32 %v1948_v4, %v1960_v47 }
0x12dc   :  { %v1959_v39 = vpop.xlane.xlu1 %1958 }
0x12dd   :  { %v1961_v7 = vmul.f32 0.03125, %v1959_v39  ;;  %v1964_v8 = vmul.f32 %v1962_v49, %v1962_v49 }
0x12df   :  { %v1963_v9 = vsub.f32 %v1949_v6, %v1961_v7  ;;  %v1966_v10 = vsel %vm72_vm0, %v1964_v8, 0.0 }
0x12e0   :  { %1967 = vadd.xlane.f32.xlu0 %v1966_v10 }
0x12e1   :  { %v1965_v11 = vmul.f32 %v1963_v9, %v1963_v9 }
0x12e3   :  { %v1969_v3 = vsel %vm72_vm0, %v1965_v11, 0.0 }
0x12e4   :  { %1970 = vadd.xlane.f32.xlu1 %v1969_v3 }
0x1369   :  { %v1968_v16 = vpop.xlane.xlu0 %1967 }
0x136a   :  { %v1972_v13 = vmul.f32 0.03125, %v1968_v16 }
0x136c   :  { %v1974_v18 = vadd.f32 1e-12, %v1972_v13 }
0x136d   :  { %v1971_v19 = vpop.xlane.xlu1 %1970 }
0x136e   :  { %2610 = vrsqrt.f32 %v1974_v18  ;;  %v1973_v22 = vmul.f32 0.03125, %v1971_v19 }
0x1370   :  { %v1975_v17 = vadd.f32 1e-12, %v1973_v22 }
0x1372   :  { %2612 = vrsqrt.f32 %v1975_v17 }
0x137b   :  { %v2611_v20 = vpop.eup %2610 }
0x137c   :  { %v1978_v32 = vmul.f32 %v2611_v20, %v1962_v49 }
0x137e   :  { %v1986_v29 = vmul.f32 %v2234_v23, %v1978_v32 }
0x137f   :  { %v2613_v24 = vpop.eup %2612 }
0x1380   :  { %v1979_v27 = vmul.f32 %v2613_v24, %v1963_v9  ;;  %v1994_v46 = vadd.f32 %v2235_v33, %v1986_v29 }
0x1382   :  { %v1987_v25 = vmul.f32 %v2234_v23, %v1979_v27 }
0x1384   :  { %v1995_v54 = vadd.f32 %v2235_v33, %v1987_v25 }
0x1386   :  { %v1996_v55 = vpack.c.bf16 %v1995_v54, %v1994_v46 }
0x1388   :  { %2483 = vmatmul.mubr.msk.bf16.vlgmr.msra.gmra.mxu1 %vm72_vm0, %v1996_v55 }
0x1389   :  { %2490 = vmatprep.mubr.msk.bf16.mxu1 %vm2619_vm1, %v2618_v14  ;;  %2487 = vmatpush3.bf16.msra.mxu1 %v2520_v26  ;;  %vm2134_vm1 = vcmask 7168  }
0x138a   :  { %2488 = vmatprep.subr.bf16.mxu1 %v2618_v14 }
0x138d   :  { %2489 = vmatpush3.bf16.msra.mxu1 %v2521_v28 }
0x1448   :  { %v2057_v35 = vpop.f32.mrf.mxu1 }
0x1449   :  { %v2058_v36 = vadd.f32 %v2236_v63, %v2057_v35 }
0x144a   :  { %v2484_v37 = vpop.f32.mrf.mxu1 }
0x144b   :  { %2614 = vtanh.f32 %v2058_v36 }
0x144c   :  { %v2060_v40 = vpop.f32.mrf.mxu1 }
0x144d   :  { %v2061_v41 = vadd.f32 %v2236_v63, %v2060_v40 }
0x144e   :  { %v2485_v42 = vpop.f32.mrf.mxu1 }
0x144f   :  { %2616 = vtanh.f32 %v2061_v41 }
0x1458   :  { %v2615_v43 = vpop.eup %2614 }
0x145c   :  { %v2617_v14 = vpop.eup %2616 }
0x145d   :  { %v2066_v45 = vpack.c.bf16 %v2617_v14, %v2615_v43 }
0x145f   :  { %2491 = vmatmul.mubr.msk.bf16.vlgmr.msra.gmra.mxu1 %vm72_vm0, %v2066_v45 }
0x151f   :  { %v2127_v50 = vpop.f32.mrf.mxu1 }
0x1520   :  { %v2128_v51 = vadd.f32 %v2240_v48, %v2127_v50 }
0x1521   :  { %v2492_v52 = vpop.f32.mrf.mxu1 }
0x1522   :  { %2135 = vst.msk [vmem:[%s3256_s20] sm:$0xff] %vm2134_vm1, %v2128_v51 }
0x1523   :  { %v2130_v53 = vpop.f32.mrf.mxu1 }
0x1524   :  { %v2131_v56 = vadd.f32 %v2240_v48, %v2130_v53 }
0x1525   :  { %v2493_v57 = vpop.f32.mrf.mxu1 }
0x1526   :  { %2136 = vst.msk [vmem:[%s3256_s20 + $0x8] sm:$0xff] %vm2134_vm1, %v2131_v56 }

</bundles_post_ra>
